<compile_context>
chip_gen: v7x
topology: tpu7x:2x2x1
jax: 0.10.0
libtpu: 0.0.40
codegen_flags: <defaults>
</compile_context>

<pallas_src>
import functools

import jax
import jax.numpy as jnp
from jax.experimental import pallas as pl
from jax.experimental.pallas import tpu as pltpu


def _layernorm(y, gamma, beta, eps=1e-5):
    mean = jnp.mean(y, axis=-1, keepdims=True)
    var = jnp.mean((y - mean) ** 2, axis=-1, keepdims=True)
    return (y - mean) * jax.lax.rsqrt(var + eps) * gamma + beta


# ---------------------------------------------------------------------------
# Kernel 1: one InfiniTransformer block, grid over (batch, sequence segments).
# ---------------------------------------------------------------------------
def infini_block_kernel(x_ref, wqkv_ref, wo_ref, g_ref, init_mem_ref, init_z_ref,
                        w1_ref, b1_ref, w2_ref, b2_ref, gamma_ref, beta_ref,
                        out_ref, mem_scr, z_scr,
                        *, SEG, D, H, DK, DV, update):
    seg = pl.program_id(1)

    # (Re)initialize compressive-memory state at the first segment of each batch row.
    @pl.when(seg == 0)
    def _():
        mem_scr[...] = init_mem_ref[...]
        z_scr[...] = init_z_ref[...]

    x = x_ref[...]                                   # (SEG, D) f32
    xb = x.astype(jnp.bfloat16)

    # Fused QKV projection for all heads: one lane-dense matmul (bf16 in, f32 acc).
    qkv = jnp.dot(xb, wqkv_ref[...], preferred_element_type=jnp.float32)
    q = qkv[:, :H * DK]
    k = qkv[:, H * DK:2 * H * DK]
    v = qkv[:, 2 * H * DK:]

    # sigma = elu + 1, computed on the wide layout in f32.
    sigma_q = jnp.where(q > 0, q + 1.0, jnp.exp(q))
    sigma_k = jnp.where(k > 0, k + 1.0, jnp.exp(k))

    # Head-major 3D views for per-head (batched) contractions.
    q3 = q.reshape(SEG, H, DK).transpose(1, 0, 2)          # (H, SEG, DK)
    k3 = k.reshape(SEG, H, DK).transpose(1, 0, 2)
    v3 = v.reshape(SEG, H, DV).transpose(1, 0, 2)          # (H, SEG, DV)
    sq3 = sigma_q.reshape(SEG, H, DK).transpose(1, 0, 2)
    sk3 = sigma_k.reshape(SEG, H, DK).transpose(1, 0, 2)

    mem = mem_scr[...]                                     # (H, DK, DV) f32 state
    z = z_scr[...]                                         # (H, DK)     f32 state

    # --- memory retrieval (uses pre-update state); state math kept in f32 ---
    num = jnp.einsum('hqd,hdv->hqv', sq3, mem, preferred_element_type=jnp.float32)
    den = jnp.sum(sq3 * z[:, None, :], axis=-1, keepdims=True)      # (H, SEG, 1)
    att_mem = num * pl.reciprocal(den, approx=True)

    # --- local (non-causal) softmax attention within the segment ---
    scale = 1.0 / (DK ** 0.5)
    s = jnp.einsum('hqd,hkd->hqk',
                   q3.astype(jnp.bfloat16), k3.astype(jnp.bfloat16),
                   preferred_element_type=jnp.float32) * scale
    s = s - jnp.max(s, axis=-1, keepdims=True)
    p = jnp.exp(s)
    p = p * pl.reciprocal(jnp.sum(p, axis=-1, keepdims=True), approx=True)
    att_dot = jnp.einsum('hqk,hkv->hqv',
                         p.astype(jnp.bfloat16), v3.astype(jnp.bfloat16),
                         preferred_element_type=jnp.float32)

    # --- memory update ---
    if update == 'delta':
        retr = jnp.einsum('hkd,hdv->hkv', sk3, mem,
                          preferred_element_type=jnp.float32)
        den_k = jnp.sum(sk3 * z[:, None, :], axis=-1, keepdims=True)
        v_upd = v3 - retr * pl.reciprocal(den_k, approx=True)
    else:                                     # 'linear'
        v_upd = v3
    mem_scr[...] = mem + jnp.einsum('hkd,hkv->hdv', sk3, v_upd,
                                    preferred_element_type=jnp.float32)
    z_scr[...] = z + jnp.sum(sk3, axis=1)

    # --- gated mix of memory retrieval and local attention ---
    # g = sigmoid(betas) is precomputed once in the wrapper (hoisted invariant).
    g = g_ref[...][:, None, :]                             # (H, 1, DV)
    att = g * att_mem + (1.0 - g) * att_dot                # (H, SEG, DV)

    # Output projection: concat heads -> one matmul with the fused (H*DV, D) weight.
    att_c = att.transpose(1, 0, 2).reshape(SEG, H * DV)
    attn_out = jnp.dot(att_c.astype(jnp.bfloat16), wo_ref[...],
                       preferred_element_type=jnp.float32)

    # --- MLP (relu) + residual from block input + LayerNorm ---
    h1 = jnp.dot(attn_out.astype(jnp.bfloat16), w1_ref[...],
                 preferred_element_type=jnp.float32) + b1_ref[...]
    h1 = jnp.maximum(h1, 0.0)
    mlp = jnp.dot(h1.astype(jnp.bfloat16), w2_ref[...],
                  preferred_element_type=jnp.float32) + b2_ref[...]
    out_ref[...] = _layernorm(mlp + x, gamma_ref[...], beta_ref[...])


def _prep_layer(p):
    """Fuse per-head weights into lane-dense layouts and cast matmul weights to bf16."""
    H, D, DK = p['wq'].shape
    DV = p['wv'].shape[2]
    wq = jnp.transpose(p['wq'], (1, 0, 2)).reshape(D, H * DK)
    wk = jnp.transpose(p['wk'], (1, 0, 2)).reshape(D, H * DK)
    wv = jnp.transpose(p['wv'], (1, 0, 2)).reshape(D, H * DV)
    return dict(
        wqkv=jnp.concatenate([wq, wk, wv], axis=1).astype(jnp.bfloat16),
        wo=p['wo'].reshape(H * DV, D).astype(jnp.bfloat16),
        g=jax.nn.sigmoid(p['betas']).reshape(H, DV).astype(jnp.float32),
        init_mem=p['init_mem'].astype(jnp.float32),
        init_z=p['init_z'].reshape(H, DK).astype(jnp.float32),
        w1=p['w1'].astype(jnp.bfloat16), b1=p['b1'].astype(jnp.float32),
        w2=p['w2'].astype(jnp.bfloat16), b2=p['b2'].astype(jnp.float32),
        ln_g=p['ln_g'], ln_b=p['ln_b'],
    )


def run_infini_block(x, layer, *, segment_len, update):
    B, S, D = x.shape
    H, _, DK = layer['wq'].shape
    DV = layer['wv'].shape[2]
    HID = layer['w1'].shape[1]
    assert S % segment_len == 0
    SEG = segment_len
    n_seg = S // SEG

    lp = _prep_layer(layer)

    kernel = functools.partial(infini_block_kernel, SEG=SEG, D=D, H=H,
                               DK=DK, DV=DV, update=update)

    inputs = (x, lp['wqkv'], lp['wo'], lp['g'], lp['init_mem'], lp['init_z'],
              lp['w1'], lp['b1'], lp['w2'], lp['b2'], lp['ln_g'], lp['ln_b'])

    def const_spec(a):
        nd = a.ndim
        return pl.BlockSpec(a.shape, lambda b, s, _nd=nd: (0,) * _nd)

    in_specs = ([pl.BlockSpec((None, SEG, D), lambda b, s: (b, s, 0))]
                + [const_spec(a) for a in inputs[1:]])
    out_specs = pl.BlockSpec((None, SEG, D), lambda b, s: (b, s, 0))

    flops = 2 * B * S * (D * H * (2 * DK + DV) + H * SEG * (DK + DV)
                         + 2 * H * DK * DV + H * DV * D + 2 * D * HID)
    transcendentals = B * S * (2 * H * DK + H * SEG)
    bytes_accessed = (2 * x.size * 4
                      + sum(int(a.size) * a.dtype.itemsize for a in inputs[1:]))

    return pl.pallas_call(
        kernel,
        out_shape=jax.ShapeDtypeStruct((B, S, D), jnp.float32),
        grid_spec=pltpu.PrefetchScalarGridSpec(
            num_scalar_prefetch=0,
            grid=(B, n_seg),
            in_specs=in_specs,
            out_specs=out_specs,
            scratch_shapes=[pltpu.VMEM((H, DK, DV), jnp.float32),   # mem state
                            pltpu.VMEM((H, DK), jnp.float32)]),     # z state
        compiler_params=pltpu.CompilerParams(
            dimension_semantics=("parallel", "arbitrary"),
            vmem_limit_bytes=48 * 1024 * 1024),
        cost_estimate=pl.CostEstimate(flops=int(flops),
                                      transcendentals=int(transcendentals),
                                      bytes_accessed=int(bytes_accessed)),
    )(*inputs)


# ---------------------------------------------------------------------------
# Kernel 2: final LayerNorm + vocab projection (lm head, no bias), tiled over
# (sequence, vocab).  The normalized activations are computed once per sequence
# tile into a bf16 VMEM scratch (vocab axis is "arbitrary"/inner), then reused
# for every vocab tile; the vocab weight is streamed/double-buffered and output
# stores are lane-dense.
# ---------------------------------------------------------------------------
def final_head_kernel(x_ref, gamma_ref, beta_ref, w_ref, out_ref, y_scr):
    j = pl.program_id(1)
    B, tS, D = x_ref.shape
    tV = w_ref.shape[1]

    @pl.when(j == 0)
    def _():
        x = x_ref[...]                               # (B, tS, D) f32
        y = _layernorm(x.reshape(B * tS, D), gamma_ref[...], beta_ref[...])
        y_scr[...] = y.astype(jnp.bfloat16)

    logits = jnp.dot(y_scr[...], w_ref[...], preferred_element_type=jnp.float32)
    out_ref[...] = logits.reshape(B, tS, tV)


def _pick_tile(total, target, align):
    """Largest divisor of `total` that is a multiple of `align` and <= target."""
    if total <= target:
        return total
    t = (min(target, total) // align) * align
    while t >= align:
        if total % t == 0:
            return t
        t -= align
    return total


def run_final_head(x, gamma, beta, w):
    B, S, D = x.shape
    V = w.shape[1]
    wb = w.astype(jnp.bfloat16)
    tS = _pick_tile(S, 256, 8)
    tV = _pick_tile(V, 512, 128)
    grid = (S // tS, V // tV)

    return pl.pallas_call(
        final_head_kernel,
        out_shape=jax.ShapeDtypeStruct((B, S, V), jnp.float32),
        grid_spec=pltpu.PrefetchScalarGridSpec(
            num_scalar_prefetch=0,
            grid=grid,
            in_specs=[pl.BlockSpec((B, tS, D), lambda i, j: (0, i, 0)),
                      pl.BlockSpec(gamma.shape, lambda i, j: (0, 0)),
                      pl.BlockSpec(beta.shape, lambda i, j: (0, 0)),
                      pl.BlockSpec((D, tV), lambda i, j: (0, j))],
            out_specs=pl.BlockSpec((B, tS, tV), lambda i, j: (0, i, j)),
            scratch_shapes=[pltpu.VMEM((B * tS, D), jnp.bfloat16)]),
        compiler_params=pltpu.CompilerParams(
            dimension_semantics=("parallel", "arbitrary"),
            vmem_limit_bytes=48 * 1024 * 1024),
        cost_estimate=pl.CostEstimate(flops=int(2 * B * S * D * V),
                                      transcendentals=0,
                                      bytes_accessed=int(x.size * 4 + wb.size * 2
                                                         + B * S * V * 4)),
    )(x, gamma, beta, wb)


# ---------------------------------------------------------------------------
# Parameter construction (deterministic, synthetic) and full forward pass.
# ---------------------------------------------------------------------------
def init_params(key, cfg):
    V, D, HID = cfg['vocab_size'], cfg['emb_dim'], cfg['hidden_dim']
    DK = DV = cfg['key_value_dim']
    H = cfg['num_attention_heads']
    CTX = cfg['context_length']
    n_layers = cfg['n_layers']

    keys = iter(jax.random.split(key, 8 + 8 * n_layers))

    def normal(k, shape, scale=0.02):
        return (scale * jax.random.normal(k, shape)).astype(jnp.float32)

    params = {
        'tok_emb': normal(next(keys), (V, D)),
        'pos_emb': normal(next(keys), (CTX, D)),
        'final_g': jnp.ones((1, D), jnp.float32),
        'final_b': jnp.zeros((1, D), jnp.float32),
        'ff_w': normal(next(keys), (D, V)),      # lm head, bias=False
        'layers': [],
    }
    for _ in range(n_layers):
        params['layers'].append({
            'wq': normal(next(keys), (H, D, DK)),
            'wk': normal(next(keys), (H, D, DK)),
            'wv': normal(next(keys), (H, D, DV)),
            'wo': normal(next(keys), (H, DV, D)),
            'betas': normal(next(keys), (H, 1, DV)),
            'init_mem': normal(next(keys), (H, DK, DV)),   # learnable init memory
            'init_z': jnp.ones((H, 1, DK), jnp.float32),   # learnable init z (ones)
            'w1': normal(next(keys), (D, HID)),
            'b1': jnp.zeros((1, HID), jnp.float32),
            'w2': normal(next(keys), (HID, D)),
            'b2': jnp.zeros((1, D), jnp.float32),
            'ln_g': jnp.ones((1, D), jnp.float32),
            'ln_b': jnp.zeros((1, D), jnp.float32),
        })
    return params


def infini_gpt_forward(params, context, cfg):
    B, S = context.shape
    # Embedding lookups are glue (plain JAX gather); dropout is identity at inference.
    x = params['tok_emb'][context] + params['pos_emb'][:S][None, :, :]
    for layer in params['layers']:
        x = run_infini_block(x, layer,
                             segment_len=cfg['segment_len'], update=cfg['update'])
    logits = run_final_head(x, params['final_g'], params['final_b'], params['ff_w'])
    return logits


if __name__ == "__main__":
    cfg = dict(vocab_size=64, emb_dim=32, context_length=16, hidden_dim=64,
               key_value_dim=16, num_attention_heads=2, segment_len=8,
               update='linear', n_layers=2, drop_rate=0.0)

    key = jax.random.PRNGKey(0)
    pkey, ckey = jax.random.split(key)
    params = init_params(pkey, cfg)

    B, S = 2, 16
    context = jax.random.randint(ckey, (B, S), 0, cfg['vocab_size'], dtype=jnp.int32)

    logits = infini_gpt_forward(params, context, cfg)
    jax.block_until_ready(logits)
    assert logits.shape == (B, S, cfg['vocab_size'])
    assert bool(jnp.all(jnp.isfinite(logits)))
    print("KERNEL_OK")
</pallas_src>

<mosaic_0001>
module attributes {stable_mosaic.version = 11 : i64} {
  func.func @infini_block_kernel(%arg0: i32, %arg1: i32, %arg2: memref<1x8x32xf32, #tpu.memory_space<vmem>>, %arg3: memref<32x96xbf16, #tpu.memory_space<vmem>>, %arg4: memref<32x32xbf16, #tpu.memory_space<vmem>>, %arg5: memref<2x16xf32, #tpu.memory_space<vmem>>, %arg6: memref<2x16x16xf32, #tpu.memory_space<vmem>>, %arg7: memref<2x16xf32, #tpu.memory_space<vmem>>, %arg8: memref<32x64xbf16, #tpu.memory_space<vmem>>, %arg9: memref<1x64xf32, #tpu.memory_space<vmem>>, %arg10: memref<64x32xbf16, #tpu.memory_space<vmem>>, %arg11: memref<1x32xf32, #tpu.memory_space<vmem>>, %arg12: memref<1x32xf32, #tpu.memory_space<vmem>>, %arg13: memref<1x32xf32, #tpu.memory_space<vmem>>, %arg14: memref<1x8x32xf32, #tpu.memory_space<vmem>>, %arg15: memref<2x16x16xf32, #tpu.memory_space<vmem>>, %arg16: memref<2x16xf32, #tpu.memory_space<vmem>>) attributes {dimension_semantics = [#tpu.dimension_semantics<parallel>, #tpu.dimension_semantics<arbitrary>], iteration_bounds = array<i64: 2, 2>, scalar_prefetch = 0 : i64, scratch_operands = 2 : i64, tpu.core_type = #tpu.core_type<tc>, window_params = [{transform_indices = @transform_0, window_bounds = array<i64: 1, 8, 32>}, {pipeline_mode = #tpu.pipeline_mode<synchronous>, transform_indices = @transform_1, window_bounds = array<i64: 32, 96>}, {pipeline_mode = #tpu.pipeline_mode<synchronous>, transform_indices = @transform_2, window_bounds = array<i64: 32, 32>}, {pipeline_mode = #tpu.pipeline_mode<synchronous>, transform_indices = @transform_3, window_bounds = array<i64: 2, 16>}, {pipeline_mode = #tpu.pipeline_mode<synchronous>, transform_indices = @transform_4, window_bounds = array<i64: 2, 16, 16>}, {pipeline_mode = #tpu.pipeline_mode<synchronous>, transform_indices = @transform_5, window_bounds = array<i64: 2, 16>}, {pipeline_mode = #tpu.pipeline_mode<synchronous>, transform_indices = @transform_6, window_bounds = array<i64: 32, 64>}, {pipeline_mode = #tpu.pipeline_mode<synchronous>, transform_indices = @transform_7, window_bounds = array<i64: 1, 64>}, {pipeline_mode = #tpu.pipeline_mode<synchronous>, transform_indices = @transform_8, window_bounds = array<i64: 64, 32>}, {pipeline_mode = #tpu.pipeline_mode<synchronous>, transform_indices = @transform_9, window_bounds = array<i64: 1, 32>}, {pipeline_mode = #tpu.pipeline_mode<synchronous>, transform_indices = @transform_10, window_bounds = array<i64: 1, 32>}, {pipeline_mode = #tpu.pipeline_mode<synchronous>, transform_indices = @transform_11, window_bounds = array<i64: 1, 32>}, {transform_indices = @transform_12, window_bounds = array<i64: 1, 8, 32>}]} {
    %c0_i32 = arith.constant 0 : i32
    %0 = arith.cmpi eq, %arg1, %c0_i32 : i32
    %1 = arith.extui %0 : i1 to i32
    %c0_i32_0 = arith.constant 0 : i32
    %2 = arith.cmpi ne, %1, %c0_i32_0 : i32
    scf.if %2 {
      %c0_57 = arith.constant 0 : index
      %c0_58 = arith.constant 0 : index
      %c0_59 = arith.constant 0 : index
      %124 = vector.load %arg6[%c0_57, %c0_58, %c0_59] : memref<2x16x16xf32, #tpu.memory_space<vmem>>, vector<2x16x16xf32>
      %c0_60 = arith.constant 0 : index
      %c0_61 = arith.constant 0 : index
      %c0_62 = arith.constant 0 : index
      %125 = vector.load %arg15[%c0_60, %c0_61, %c0_62] : memref<2x16x16xf32, #tpu.memory_space<vmem>>, vector<2x16x16xf32>
      tpu.vector_store %arg15[%c0_60, %c0_61, %c0_62], %124 {strides = array<i32>} : memref<2x16x16xf32, #tpu.memory_space<vmem>>, vector<2x16x16xf32>,
      %c0_63 = arith.constant 0 : index
      %c0_64 = arith.constant 0 : index
      %126 = vector.load %arg7[%c0_63, %c0_64] : memref<2x16xf32, #tpu.memory_space<vmem>>, vector<2x16xf32>
      %c0_65 = arith.constant 0 : index
      %c0_66 = arith.constant 0 : index
      %127 = vector.load %arg16[%c0_65, %c0_66] : memref<2x16xf32, #tpu.memory_space<vmem>>, vector<2x16xf32>
      tpu.vector_store %arg16[%c0_65, %c0_66], %126 {strides = array<i32>} : memref<2x16xf32, #tpu.memory_space<vmem>>, vector<2x16xf32>,
    } else {
    }
    %c0 = arith.constant 0 : index
    %c0_1 = arith.constant 0 : index
    %c0_2 = arith.constant 0 : index
    %3 = vector.load %arg2[%c0, %c0_1, %c0_2] : memref<1x8x32xf32, #tpu.memory_space<vmem>>, vector<1x8x32xf32>
    %4 = vector.shape_cast %3 : vector<1x8x32xf32> to vector<8x32xf32>
    %5 = arith.truncf %4 : vector<8x32xf32> to vector<8x32xbf16>
    %c0_3 = arith.constant 0 : index
    %c0_4 = arith.constant 0 : index
    %6 = vector.load %arg3[%c0_3, %c0_4] : memref<32x96xbf16, #tpu.memory_space<vmem>>, vector<32x96xbf16>
    %cst = arith.constant dense<0.000000e+00> : vector<8x96xf32>
    %7 = tpu.matmul %5, %6, %cst {dimension_numbers = #tpu.dot_dimension_numbers<[1], [0], [0], [1], [0, 0, 1, 1], [], []>} : vector<8x32xbf16>, vector<32x96xbf16>, vector<8x96xf32> -> vector<8x96xf32>
    %8 = vector.extract_strided_slice %7 {offsets = [0, 0], sizes = [8, 32], strides = [1, 1]} : vector<8x96xf32> to vector<8x32xf32>
    %9 = vector.extract_strided_slice %7 {offsets = [0, 32], sizes = [8, 32], strides = [1, 1]} : vector<8x96xf32> to vector<8x32xf32>
    %10 = vector.extract_strided_slice %7 {offsets = [0, 64], sizes = [8, 32], strides = [1, 1]} : vector<8x96xf32> to vector<8x32xf32>
    %cst_5 = arith.constant 0.000000e+00 : f32
    %11 = vector.broadcast %cst_5 : f32 to vector<8x32xf32>
    %12 = arith.cmpf ogt, %8, %11 : vector<8x32xf32>
    %cst_6 = arith.constant 1.000000e+00 : f32
    %13 = vector.broadcast %cst_6 : f32 to vector<8x32xf32>
    %14 = arith.addf %8, %13 : vector<8x32xf32>
    %15 = math.exp %8 : vector<8x32xf32>
    %16 = arith.select %12, %14, %15 : vector<8x32xi1>, vector<8x32xf32>
    %cst_7 = arith.constant 0.000000e+00 : f32
    %17 = vector.broadcast %cst_7 : f32 to vector<8x32xf32>
    %18 = arith.cmpf ogt, %9, %17 : vector<8x32xf32>
    %cst_8 = arith.constant 1.000000e+00 : f32
    %19 = vector.broadcast %cst_8 : f32 to vector<8x32xf32>
    %20 = arith.addf %9, %19 : vector<8x32xf32>
    %21 = math.exp %9 : vector<8x32xf32>
    %22 = arith.select %18, %20, %21 : vector<8x32xi1>, vector<8x32xf32>
    %23 = vector.shape_cast %8 : vector<8x32xf32> to vector<8x2x16xf32>
    %24 = tpu.transpose %23, [1, 0, 2] : vector<8x2x16xf32> -> vector<2x8x16xf32>
    %25 = vector.shape_cast %9 : vector<8x32xf32> to vector<8x2x16xf32>
    %26 = tpu.transpose %25, [1, 0, 2] : vector<8x2x16xf32> -> vector<2x8x16xf32>
    %27 = vector.shape_cast %10 : vector<8x32xf32> to vector<8x2x16xf32>
    %28 = tpu.transpose %27, [1, 0, 2] : vector<8x2x16xf32> -> vector<2x8x16xf32>
    %29 = vector.shape_cast %16 : vector<8x32xf32> to vector<8x2x16xf32>
    %30 = tpu.transpose %29, [1, 0, 2] : vector<8x2x16xf32> -> vector<2x8x16xf32>
    %31 = vector.shape_cast %22 : vector<8x32xf32> to vector<8x2x16xf32>
    %32 = tpu.transpose %31, [1, 0, 2] : vector<8x2x16xf32> -> vector<2x8x16xf32>
    %c0_9 = arith.constant 0 : index
    %c0_10 = arith.constant 0 : index
    %c0_11 = arith.constant 0 : index
    %33 = vector.load %arg15[%c0_9, %c0_10, %c0_11] : memref<2x16x16xf32, #tpu.memory_space<vmem>>, vector<2x16x16xf32>
    %c0_12 = arith.constant 0 : index
    %c0_13 = arith.constant 0 : index
    %34 = vector.load %arg16[%c0_12, %c0_13] : memref<2x16xf32, #tpu.memory_space<vmem>>, vector<2x16xf32>
    "tpu.trace_start"() <{level = 10 : i32, message = "hqd,hdv->hqv"}> : () -> ()
    %cst_14 = arith.constant dense<0.000000e+00> : vector<2x8x16xf32>
    %35 = tpu.matmul %30, %33, %cst_14 {dimension_numbers = #tpu.dot_dimension_numbers<[2], [1], [1], [2], [0, 0, 0, 1, 1, 2], [0], [0]>} : vector<2x8x16xf32>, vector<2x16x16xf32>, vector<2x8x16xf32> -> vector<2x8x16xf32>
    "tpu.trace_stop"() : () -> ()
    %36 = vector.shape_cast %34 : vector<2x16xf32> to vector<2x1x16xf32>
    %37 = vector.broadcast %36 : vector<2x1x16xf32> to vector<2x8x16xf32>
    %38 = arith.mulf %30, %37 : vector<2x8x16xf32>
    %cst_15 = arith.constant dense<0.000000e+00> : vector<2x8xf32>
    %39 = vector.multi_reduction <add>, %38, %cst_15 [2] : vector<2x8x16xf32> to vector<2x8xf32>
    %40 = vector.shape_cast %39 : vector<2x8xf32> to vector<2x8x1xf32>
    %41 = tpu.reciprocal %40 {approx = true} : vector<2x8x1xf32> -> vector<2x8x1xf32>
    %42 = vector.broadcast %41 : vector<2x8x1xf32> to vector<2x8x16xf32>
    %43 = arith.mulf %35, %42 : vector<2x8x16xf32>
    %44 = arith.truncf %24 : vector<2x8x16xf32> to vector<2x8x16xbf16>
    %45 = arith.truncf %26 : vector<2x8x16xf32> to vector<2x8x16xbf16>
    "tpu.trace_start"() <{level = 10 : i32, message = "hqd,hkd->hqk"}> : () -> ()
    %cst_16 = arith.constant dense<0.000000e+00> : vector<2x8x8xf32>
    %46 = tpu.matmul %44, %45, %cst_16 {dimension_numbers = #tpu.dot_dimension_numbers<[2], [2], [1], [1], [0, 0, 0, 1, 1, 1], [0], [0]>} : vector<2x8x16xbf16>, vector<2x8x16xbf16>, vector<2x8x8xf32> -> vector<2x8x8xf32>
    "tpu.trace_stop"() : () -> ()
    %cst_17 = arith.constant 2.500000e-01 : f32
    %47 = vector.broadcast %cst_17 : f32 to vector<2x8x8xf32>
    %48 = arith.mulf %46, %47 : vector<2x8x8xf32>
    %cst_18 = arith.constant dense<0xFF800000> : vector<2x8xf32>
    %49 = vector.multi_reduction <maximumf>, %48, %cst_18 [2] : vector<2x8x8xf32> to vector<2x8xf32>
    %50 = vector.shape_cast %49 : vector<2x8xf32> to vector<2x8x1xf32>
    %51 = vector.broadcast %50 : vector<2x8x1xf32> to vector<2x8x8xf32>
    %52 = arith.subf %48, %51 : vector<2x8x8xf32>
    %53 = math.exp %52 : vector<2x8x8xf32>
    %cst_19 = arith.constant dense<0.000000e+00> : vector<2x8xf32>
    %54 = vector.multi_reduction <add>, %53, %cst_19 [2] : vector<2x8x8xf32> to vector<2x8xf32>
    %55 = vector.shape_cast %54 : vector<2x8xf32> to vector<2x8x1xf32>
    %56 = tpu.reciprocal %55 {approx = true} : vector<2x8x1xf32> -> vector<2x8x1xf32>
    %57 = vector.broadcast %56 : vector<2x8x1xf32> to vector<2x8x8xf32>
    %58 = arith.mulf %53, %57 : vector<2x8x8xf32>
    %59 = arith.truncf %58 : vector<2x8x8xf32> to vector<2x8x8xbf16>
    %60 = arith.truncf %28 : vector<2x8x16xf32> to vector<2x8x16xbf16>
    "tpu.trace_start"() <{level = 10 : i32, message = "hqk,hkv->hqv"}> : () -> ()
    %cst_20 = arith.constant dense<0.000000e+00> : vector<2x8x16xf32>
    %61 = tpu.matmul %59, %60, %cst_20 {dimension_numbers = #tpu.dot_dimension_numbers<[2], [1], [1], [2], [0, 0, 0, 1, 1, 2], [0], [0]>} : vector<2x8x8xbf16>, vector<2x8x16xbf16>, vector<2x8x16xf32> -> vector<2x8x16xf32>
    "tpu.trace_stop"() : () -> ()
    "tpu.trace_start"() <{level = 10 : i32, message = "hkd,hkv->hdv"}> : () -> ()
    %cst_21 = arith.constant dense<0.000000e+00> : vector<2x16x16xf32>
    %62 = tpu.matmul %32, %28, %cst_21 {dimension_numbers = #tpu.dot_dimension_numbers<[1], [1], [2], [2], [0, 0, 0, 2, 1, 2], [0], [0]>} : vector<2x8x16xf32>, vector<2x8x16xf32>, vector<2x16x16xf32> -> vector<2x16x16xf32>
    "tpu.trace_stop"() : () -> ()
    %63 = arith.addf %33, %62 : vector<2x16x16xf32>
    %c0_22 = arith.constant 0 : index
    %c0_23 = arith.constant 0 : index
    %c0_24 = arith.constant 0 : index
    %64 = vector.load %arg15[%c0_22, %c0_23, %c0_24] : memref<2x16x16xf32, #tpu.memory_space<vmem>>, vector<2x16x16xf32>
    tpu.vector_store %arg15[%c0_22, %c0_23, %c0_24], %63 {strides = array<i32>} : memref<2x16x16xf32, #tpu.memory_space<vmem>>, vector<2x16x16xf32>,
    %cst_25 = arith.constant dense<0.000000e+00> : vector<2x16xf32>
    %65 = vector.multi_reduction <add>, %32, %cst_25 [1] : vector<2x8x16xf32> to vector<2x16xf32>
    %66 = arith.addf %34, %65 : vector<2x16xf32>
    %c0_26 = arith.constant 0 : index
    %c0_27 = arith.constant 0 : index
    %67 = vector.load %arg16[%c0_26, %c0_27] : memref<2x16xf32, #tpu.memory_space<vmem>>, vector<2x16xf32>
    tpu.vector_store %arg16[%c0_26, %c0_27], %66 {strides = array<i32>} : memref<2x16xf32, #tpu.memory_space<vmem>>, vector<2x16xf32>,
    %c0_28 = arith.constant 0 : index
    %c0_29 = arith.constant 0 : index
    %68 = vector.load %arg5[%c0_28, %c0_29] : memref<2x16xf32, #tpu.memory_space<vmem>>, vector<2x16xf32>
    %69 = vector.shape_cast %68 : vector<2x16xf32> to vector<2x1x16xf32>
    %70 = vector.broadcast %69 : vector<2x1x16xf32> to vector<2x8x16xf32>
    %71 = arith.mulf %70, %43 : vector<2x8x16xf32>
    %cst_30 = arith.constant 1.000000e+00 : f32
    %72 = vector.broadcast %cst_30 : f32 to vector<2x1x16xf32>
    %73 = arith.subf %72, %69 : vector<2x1x16xf32>
    %74 = vector.broadcast %73 : vector<2x1x16xf32> to vector<2x8x16xf32>
    %75 = arith.mulf %74, %61 : vector<2x8x16xf32>
    %76 = arith.addf %71, %75 : vector<2x8x16xf32>
    %77 = tpu.transpose %76, [1, 0, 2] : vector<2x8x16xf32> -> vector<8x2x16xf32>
    %78 = vector.shape_cast %77 : vector<8x2x16xf32> to vector<8x32xf32>
    %79 = arith.truncf %78 : vector<8x32xf32> to vector<8x32xbf16>
    %c0_31 = arith.constant 0 : index
    %c0_32 = arith.constant 0 : index
    %80 = vector.load %arg4[%c0_31, %c0_32] : memref<32x32xbf16, #tpu.memory_space<vmem>>, vector<32x32xbf16>
    %cst_33 = arith.constant dense<0.000000e+00> : vector<8x32xf32>
    %81 = tpu.matmul %79, %80, %cst_33 {dimension_numbers = #tpu.dot_dimension_numbers<[1], [0], [0], [1], [0, 0, 1, 1], [], []>} : vector<8x32xbf16>, vector<32x32xbf16>, vector<8x32xf32> -> vector<8x32xf32>
    %82 = arith.truncf %81 : vector<8x32xf32> to vector<8x32xbf16>
    %c0_34 = arith.constant 0 : index
    %c0_35 = arith.constant 0 : index
    %83 = vector.load %arg8[%c0_34, %c0_35] : memref<32x64xbf16, #tpu.memory_space<vmem>>, vector<32x64xbf16>
    %cst_36 = arith.constant dense<0.000000e+00> : vector<8x64xf32>
    %84 = tpu.matmul %82, %83, %cst_36 {dimension_numbers = #tpu.dot_dimension_numbers<[1], [0], [0], [1], [0, 0, 1, 1], [], []>} : vector<8x32xbf16>, vector<32x64xbf16>, vector<8x64xf32> -> vector<8x64xf32>
    %c0_37 = arith.constant 0 : index
    %c0_38 = arith.constant 0 : index
    %85 = vector.load %arg9[%c0_37, %c0_38] : memref<1x64xf32, #tpu.memory_space<vmem>>, vector<1x64xf32>
    %86 = vector.broadcast %85 : vector<1x64xf32> to vector<8x64xf32>
    %87 = arith.addf %84, %86 : vector<8x64xf32>
    %cst_39 = arith.constant 0.000000e+00 : f32
    %88 = vector.broadcast %cst_39 : f32 to vector<8x64xf32>
    %89 = arith.maximumf %87, %88 : vector<8x64xf32>
    %90 = arith.truncf %89 : vector<8x64xf32> to vector<8x64xbf16>
    %c0_40 = arith.constant 0 : index
    %c0_41 = arith.constant 0 : index
    %91 = vector.load %arg10[%c0_40, %c0_41] : memref<64x32xbf16, #tpu.memory_space<vmem>>, vector<64x32xbf16>
    %cst_42 = arith.constant dense<0.000000e+00> : vector<8x32xf32>
    %92 = tpu.matmul %90, %91, %cst_42 {dimension_numbers = #tpu.dot_dimension_numbers<[1], [0], [0], [1], [0, 0, 1, 1], [], []>} : vector<8x64xbf16>, vector<64x32xbf16>, vector<8x32xf32> -> vector<8x32xf32>
    %c0_43 = arith.constant 0 : index
    %c0_44 = arith.constant 0 : index
    %93 = vector.load %arg11[%c0_43, %c0_44] : memref<1x32xf32, #tpu.memory_space<vmem>>, vector<1x32xf32>
    %94 = vector.broadcast %93 : vector<1x32xf32> to vector<8x32xf32>
    %95 = arith.addf %92, %94 : vector<8x32xf32>
    %96 = arith.addf %95, %4 : vector<8x32xf32>
    %c0_45 = arith.constant 0 : index
    %c0_46 = arith.constant 0 : index
    %97 = vector.load %arg12[%c0_45, %c0_46] : memref<1x32xf32, #tpu.memory_space<vmem>>, vector<1x32xf32>
    %c0_47 = arith.constant 0 : index
    %c0_48 = arith.constant 0 : index
    %98 = vector.load %arg13[%c0_47, %c0_48] : memref<1x32xf32, #tpu.memory_space<vmem>>, vector<1x32xf32>
    %cst_49 = arith.constant dense<0.000000e+00> : vector<8xf32>
    %99 = vector.multi_reduction <add>, %96, %cst_49 [1] : vector<8x32xf32> to vector<8xf32>
    %100 = vector.shape_cast %99 : vector<8xf32> to vector<8x1xf32>
    %cst_50 = arith.constant 3.200000e+01 : f32
    %101 = vector.broadcast %cst_50 : f32 to vector<8x1xf32>
    %102 = arith.divf %100, %101 : vector<8x1xf32>
    %103 = vector.broadcast %102 : vector<8x1xf32> to vector<8x32xf32>
    %104 = arith.subf %96, %103 : vector<8x32xf32>
    %105 = arith.mulf %104, %104 : vector<8x32xf32>
    %cst_51 = arith.constant dense<0.000000e+00> : vector<8xf32>
    %106 = vector.multi_reduction <add>, %105, %cst_51 [1] : vector<8x32xf32> to vector<8xf32>
    %107 = vector.shape_cast %106 : vector<8xf32> to vector<8x1xf32>
    %cst_52 = arith.constant 3.200000e+01 : f32
    %108 = vector.broadcast %cst_52 : f32 to vector<8x1xf32>
    %109 = arith.divf %107, %108 : vector<8x1xf32>
    %110 = vector.broadcast %102 : vector<8x1xf32> to vector<8x32xf32>
    %111 = arith.subf %96, %110 : vector<8x32xf32>
    %cst_53 = arith.constant 9.99999974E-6 : f32
    %112 = vector.broadcast %cst_53 : f32 to vector<8x1xf32>
    %113 = arith.addf %109, %112 : vector<8x1xf32>
    %114 = math.rsqrt %113 : vector<8x1xf32>
    %115 = vector.broadcast %114 : vector<8x1xf32> to vector<8x32xf32>
    %116 = arith.mulf %111, %115 : vector<8x32xf32>
    %117 = vector.broadcast %97 : vector<1x32xf32> to vector<8x32xf32>
    %118 = arith.mulf %116, %117 : vector<8x32xf32>
    %119 = vector.broadcast %98 : vector<1x32xf32> to vector<8x32xf32>
    %120 = arith.addf %118, %119 : vector<8x32xf32>
    %c0_54 = arith.constant 0 : index
    %c0_55 = arith.constant 0 : index
    %c0_56 = arith.constant 0 : index
    %121 = vector.load %arg14[%c0_54, %c0_55, %c0_56] : memref<1x8x32xf32, #tpu.memory_space<vmem>>, vector<1x8x32xf32>
    %122 = vector.shape_cast %121 : vector<1x8x32xf32> to vector<8x32xf32>
    %123 = vector.shape_cast %120 : vector<8x32xf32> to vector<1x8x32xf32>
    tpu.vector_store %arg14[%c0_54, %c0_55, %c0_56], %123 {strides = array<i32>} : memref<1x8x32xf32, #tpu.memory_space<vmem>>, vector<1x8x32xf32>,
    return
  }
  func.func @transform_0(%arg0: i32, %arg1: i32) -> (i32, i32, i32) {
    %c0_i32 = arith.constant 0 : i32
    %c0_i32_0 = arith.constant 0 : i32
    return %arg0, %arg1, %c0_i32 : i32, i32, i32
  }
  func.func @transform_1(%arg0: i32, %arg1: i32) -> (i32, i32) {
    %c0_i32 = arith.constant 0 : i32
    %c0_i32_0 = arith.constant 0 : i32
    %c0_i32_1 = arith.constant 0 : i32
    return %c0_i32, %c0_i32_0 : i32, i32
  }
  func.func @transform_2(%arg0: i32, %arg1: i32) -> (i32, i32) {
    %c0_i32 = arith.constant 0 : i32
    %c0_i32_0 = arith.constant 0 : i32
    %c0_i32_1 = arith.constant 0 : i32
    return %c0_i32, %c0_i32_0 : i32, i32
  }
  func.func @transform_3(%arg0: i32, %arg1: i32) -> (i32, i32) {
    %c0_i32 = arith.constant 0 : i32
    %c0_i32_0 = arith.constant 0 : i32
    %c0_i32_1 = arith.constant 0 : i32
    return %c0_i32, %c0_i32_0 : i32, i32
  }
  func.func @transform_4(%arg0: i32, %arg1: i32) -> (i32, i32, i32) {
    %c0_i32 = arith.constant 0 : i32
    %c0_i32_0 = arith.constant 0 : i32
    %c0_i32_1 = arith.constant 0 : i32
    %c0_i32_2 = arith.constant 0 : i32
    return %c0_i32, %c0_i32_0, %c0_i32_1 : i32, i32, i32
  }
  func.func @transform_5(%arg0: i32, %arg1: i32) -> (i32, i32) {
    %c0_i32 = arith.constant 0 : i32
    %c0_i32_0 = arith.constant 0 : i32
    %c0_i32_1 = arith.constant 0 : i32
    return %c0_i32, %c0_i32_0 : i32, i32
  }
  func.func @transform_6(%arg0: i32, %arg1: i32) -> (i32, i32) {
    %c0_i32 = arith.constant 0 : i32
    %c0_i32_0 = arith.constant 0 : i32
    %c0_i32_1 = arith.constant 0 : i32
    return %c0_i32, %c0_i32_0 : i32, i32
  }
  func.func @transform_7(%arg0: i32, %arg1: i32) -> (i32, i32) {
    %c0_i32 = arith.constant 0 : i32
    %c0_i32_0 = arith.constant 0 : i32
    %c0_i32_1 = arith.constant 0 : i32
    return %c0_i32, %c0_i32_0 : i32, i32
  }
  func.func @transform_8(%arg0: i32, %arg1: i32) -> (i32, i32) {
    %c0_i32 = arith.constant 0 : i32
    %c0_i32_0 = arith.constant 0 : i32
    %c0_i32_1 = arith.constant 0 : i32
    return %c0_i32, %c0_i32_0 : i32, i32
  }
  func.func @transform_9(%arg0: i32, %arg1: i32) -> (i32, i32) {
    %c0_i32 = arith.constant 0 : i32
    %c0_i32_0 = arith.constant 0 : i32
    %c0_i32_1 = arith.constant 0 : i32
    return %c0_i32, %c0_i32_0 : i32, i32
  }
  func.func @transform_10(%arg0: i32, %arg1: i32) -> (i32, i32) {
    %c0_i32 = arith.constant 0 : i32
    %c0_i32_0 = arith.constant 0 : i32
    %c0_i32_1 = arith.constant 0 : i32
    return %c0_i32, %c0_i32_0 : i32, i32
  }
  func.func @transform_11(%arg0: i32, %arg1: i32) -> (i32, i32) {
    %c0_i32 = arith.constant 0 : i32
    %c0_i32_0 = arith.constant 0 : i32
    %c0_i32_1 = arith.constant 0 : i32
    return %c0_i32, %c0_i32_0 : i32, i32
  }
  func.func @transform_12(%arg0: i32, %arg1: i32) -> (i32, i32, i32) {
    %c0_i32 = arith.constant 0 : i32
    %c0_i32_0 = arith.constant 0 : i32
    return %arg0, %arg1, %c0_i32 : i32, i32, i32
  }
}

</mosaic_0001>

<bundles_post_ra>
// kernel: tpu_custom_call.1
= control target key start
LH: loop header
LB: loop body
LE: loop exit
PB: predicated region body
PF: predicated region fallthrough
CT: control target
= control target key end

     0   :  { %s3515_s0 = inlined_call_operand.vmem [shape: f32[2,16,32], index: 0, kind: input, shape index: {}]   ;;  %s3516_s1 = inlined_call_operand.vmem [shape: bf16[32,96], index: 1, kind: input, shape index: {}]   ;;  %s3517_s2 = inlined_call_operand.hbm [shape: bf16[32,32], index: 2, kind: input, shape index: {}]   ;;  %s3518_s3 = inlined_call_operand.vmem [shape: f32[2,16], index: 3, kind: input, shape index: {}]   ;;  %s3519_s4 = inlined_call_operand.hbm [shape: f32[2,16,16], index: 4, kind: input, shape index: {}]   ;;  %s3520_s5 = inlined_call_operand.vmem [shape: f32[2,16], index: 5, kind: input, shape index: {}]   ;;  %s3521_s6 = inlined_call_operand.hbm [shape: bf16[32,64], index: 6, kind: input, shape index: {}]   ;;  %s3522_s7 = inlined_call_operand.vmem [shape: f32[1,64], index: 7, kind: input, shape index: {}]   ;;  %s3523_s8 = inlined_call_operand.vmem [shape: bf16[64,32], index: 8, kind: input, shape index: {}]   ;;  %s3524_s9 = inlined_call_operand.vmem [shape: f32[1,32], index: 9, kind: input, shape index: {}]   ;;  %s3525_s10 = inlined_call_operand.vmem [shape: f32[1,32], index: 10, kind: input, shape index: {}]   ;;  %s3526_s11 = inlined_call_operand.vmem [shape: f32[1,32], index: 11, kind: input, shape index: {}]   ;;  %s3527_s12 = inlined_call_operand.hbm [shape: f32[2,16,32], index: 12, kind: output, shape index: {}]  }
   0x1   :  { %3544 = sst [smem:[#allocation24_spill]] %s3525_s10 }
   0x2   :  { %3545 = sst [smem:[#allocation25_spill]] %s3526_s11 }
   0x3   :  { %3546 = sst [smem:[#allocation26_spill]] %s3527_s12 }
   0x4   :  { %17 = vsyncpa [#allocation5], 0 }
   0x5   :  { %18 = vsyncpa [#allocation8], 0 }
   0x6   :  { %19 = vsyncpa [#allocation6], 0 }
   0x7   :  { %21 = vsyncpa [#allocation6 + $0x1], 0  ;;  %s2986_s21 = smov 0   ;;  %s2988_s22 = smov 0  }
   0x8   :  { %s2990_s23 = smov 0   ;;  %s2992_s24 = smov 0  }
   0x9   :  { %s2994_s25 = smov 0   ;;  %s2996_s26 = smov 0  }
   0xa   :  { %s2998_s27 = smov 0   ;;  %s3000_s28 = smov 0  }
   0xb LB: > { %3547 = sst [smem:[#allocation14_spill]] %s2873_s21  ;;  %s2388_s29 = sadd.s32 4294967295, %s2901_s28   ;;  %s2901_s28 = sphi %s3000_s28, %s27_s28   ;;  %s2897_s27 = sphi %s2998_s27, %s3580_s27   ;;  %s2893_s26 = sphi %s2996_s26, %s3579_s26   ;;  %s2889_s25 = sphi %s2994_s25, %s3578_s25   ;;  %s2885_s24 = sphi %s2992_s24, %s3577_s24   ;;  %s2881_s23 = sphi %s2990_s23, %s3583_s23   ;;  %s2877_s22 = sphi %s2988_s22, %s3582_s22   ;;  %s2873_s21 = sphi %s2986_s21, %s3581_s21  }
   0xc   : > { %3548 = sst [smem:[#allocation15_spill]] %s2881_s23  ;;  %s2389_s30 = sadd.s32 4294967294, %s2901_s28  }
   0xd   : > { %3549 = sst [smem:[#allocation16_spill]] %s2893_s26  ;;  %s36_s13 = sadd.s32 1, %s2893_s26 }
   0xe   : > { %3550 = sst [smem:[#allocation17_spill]] %s2897_s27  ;;  %s39_s14 = sadd.s32 1, %s2897_s27 }
   0xf   : > { %3551 = sst [smem:[#allocation18_spill]] %s2901_s28  ;;  %p37_p0 = scmp.ge.s32.totalorder %s36_s13, 2 }
  0x10   : > { %s307_s15 = sadd.s32 1, %s2881_s23  ;;  %p317_p1 = scmp.ne.s32.totalorder %s2881_s23, %s2877_s22 }
  0x11   : > { %p318_p2 = scmp.eq.s32.totalorder %s2388_s29, 3  ;;  %s3585_s13 = smov (%p37_p0, %s36_s13), 0 }
  0x12   : > { %3552 = sst [smem:[#allocation19_spill]] %s3585_s13  ;;  %s3587_s14 = smov (!%p37_p0, %s39_s14), %s2897_s27 }
  0x13   : > { %s303_s16 = ssub.s32 %s2893_s26, %s3585_s13  ;;  %p3038_p3 = por %p318_p2, %p317_p1 }
  0x14   : > { %p41_p4 = scmp.ge.s32.totalorder %s3587_s14, 2  ;;  %p323_p5 = scmp.ne.s32.totalorder %s2877_s22, %s2873_s21 }
  0x15   : > { %s3553_s17 = scalar_select %p3038_p3, 1, 0 }
  0x16   : > { %p324_p6 = scmp.eq.s32.totalorder %s2389_s30, 3  ;;  %p2390_p7 = scmp.ge.s32.totalorder %s2901_s28, 1 }
  0x17   : > { %3554 = sst [smem:[#allocation20_spill]] %s3553_s17  ;;  %s3589_s14 = smov (%p41_p4, %s3587_s14), 0 }
  0x18   : > { %3555 = sst [smem:[#allocation21_spill]] %s3589_s14  ;;  %p3047_p8 = por %p324_p6, %p323_p5 }
  0x19   : > { %p331_p9 = scmp.lt.s32.totalorder %s2901_s28, 5  ;;  %s302_s19 = ssub.s32 %s2897_s27, %s3589_s14 }
  0x1a   : > { %s3556_s18 = scalar_select %p3047_p8, 1, 0 }
  0x1b   : > { %s304_s20 = sor.u32 %s303_s16, %s302_s19  ;;  %p3054_p10 = pnand %p2390_p7, %p331_p9 }
  0x1c   : > { %3557 = sst [smem:[#allocation22_spill]] %s3556_s18  ;;  %p305_p11 = scmp.eq.s32.totalorder %s304_s20, 0 }
  0x1d   : > { %s3558_s13 = scalar_select %p3054_p10, 1, 0 }
  0x1e   : > { %p3058_p12 = scmp.eq.s32.totalorder %s2388_s29, 0  ;;  %p2587_p13 = pneg %p3054_p10 }
  0x1f   : > { %s3065_s30 = scalar_select %p305_p11, %s2881_s23, %s307_s15  }
  0x20   : > { %s3559_s26 = scalar_select %p3058_p12, 1, 0 }
  0x21   : > { %3560 = sst [smem:[#allocation23_spill]] %s3065_s30  ;;  %p3069_p0 = pnand %p3058_p12, %p2587_p13 }
  0x22   : > { %s2903_s16 = smov [#allocation7]   ;;  %s2715_s29 = scalar_lea.hbm %s3519_s4, 512 }
  0x23   : > { %s362_s19 = sshll.u32 %s2903_s16, 4  ;;  %p2716_p1 = scmp.ne.s32.totalorder %s3519_s4, %s2715_s29  ;;  %s363_s19 = int_to_ptr.vmem [resolvable:$true] %s362_s19 }
  0x24   : > { %p3081_p2 = pneg %p3069_p0  ;;  %p2722_p6 = scmp.lt.u32.totalorder %s2715_s29, %s3519_s4 }
  0x26   : > { %p2718_p4 = pnand %p3081_p2, %p2716_p1 }
  0x28   : > { %p2719_p5 = pneg %p2718_p4 }
  0x2a   : > { %p2724_p7 = pnand %p2722_p6, %p2719_p5 }
  0x2c   : > { %2727 = shalt.err (!%p2724_p7)
}
  0x2d   : > { %s2728_s14 = scalar_lea.vmem %s363_s19, 512  ;;  %p2736_p8 = scmp.lt.s32.totalorder %s363_s19, %s363_s19 }
  0x2e   : > { %p2729_p9 = scmp.ne.s32.totalorder %s363_s19, %s2728_s14  ;;  %p2737_p3 = scmp.lt.s32.totalorder %s2728_s14, %s2728_s14 }
  0x30   : > { %p2731_p11 = pnand %p2729_p9, %p3081_p2  ;;  %p2738_p12 = por %p2737_p3, %p2736_p8 }
  0x32   : > { %p2732_p13 = pneg %p2731_p11 }
  0x34   : > { %p2739_p10 = pnand %p2738_p12, %p2732_p13 }
  0x36   : > { %2742 = shalt.err (!%p2739_p10)
}
  0x37   : > { %s2904_s21 = smov 128   ;;  %s2905_s27 = smov 8  }
  0x38   : > { %2593 = dma.hbm_to_vmem [thread:$0]  (!%p3069_p0), %s3519_s4, 512, %s363_s19, [#allocation8], %s2904_s21, %s2904_s21, %s2905_s27  }
  0x39   : > { %s2906_s29 = smov [#allocation4]   ;;  %s2743_s12 = scalar_lea.hbm %s3517_s2, 256 }
  0x3a   : > { %s346_s16 = sshll.u32 %s2906_s29, 4  ;;  %p2744_p3 = scmp.ne.s32.totalorder %s3517_s2, %s2743_s12  ;;  %s347_s16 = int_to_ptr.vmem [resolvable:$true] %s346_s16 }
  0x3b   : > { %p2750_p12 = scmp.lt.u32.totalorder %s2743_s12, %s3517_s2 }
  0x3c   : > { %p2746_p8 = pnand %p2744_p3, %p3081_p2 }
  0x3e   : > { %p2747_p10 = pneg %p2746_p8 }
  0x40   : > { %p2752_p1 = pnand %p2750_p12, %p2747_p10 }
  0x42   : > { %2755 = shalt.err (!%p2752_p1)
}
  0x43   : > { %s2756_s19 = scalar_lea.vmem %s347_s16, 256  ;;  %p2764_p7 = scmp.lt.s32.totalorder %s347_s16, %s347_s16 }
  0x44   : > { %p2757_p4 = scmp.ne.s32.totalorder %s347_s16, %s2756_s19  ;;  %p2765_p9 = scmp.lt.s32.totalorder %s2756_s19, %s2756_s19 }
  0x46   : > { %p2759_p5 = pnand %p2757_p4, %p3081_p2  ;;  %p2766_p11 = por %p2765_p9, %p2764_p7 }
  0x48   : > { %p2760_p6 = pneg %p2759_p5 }
  0x4a   : > { %p2767_p13 = pnand %p2766_p11, %p2760_p6 }
  0x4c   : > { %2770 = shalt.err (!%p2767_p13)
}
  0x4d   : > { %s2907_s11 = smov 64   ;;  %s2908_s23 = smov 4  }
  0x4e   : > { %2590 = dma.hbm_to_vmem [thread:$0]  (!%p3069_p0), %s3517_s2, 256, %s347_s16, [#allocation5], %s2907_s11, %s2907_s11, %s2908_s23  }
  0x4f   : > { %s2909_s28 = smov [#allocation9]   ;;  %s2771_s30 = scalar_lea.hbm %s3521_s6, 256 }
  0x50   : > { %s378_s17 = sshll.u32 %s2909_s28, 4  ;;  %p2772_p3 = scmp.ne.s32.totalorder %s3521_s6, %s2771_s30  ;;  %s379_s17 = int_to_ptr.vmem [resolvable:$true] %s378_s17 }
  0x51   : > { %p2778_p12 = scmp.lt.u32.totalorder %s2771_s30, %s3521_s6 }
  0x52   : > { %p2774_p8 = pnand %p2772_p3, %p3081_p2 }
  0x54   : > { %p2775_p10 = pneg %p2774_p8 }
  0x56   : > { %p2780_p1 = pnand %p2778_p12, %p2775_p10 }
  0x58   : > { %2783 = shalt.err (!%p2780_p1)
}
  0x59   : > { %s2784_s16 = scalar_lea.vmem %s379_s17, 256  ;;  %p2792_p7 = scmp.lt.s32.totalorder %s379_s17, %s379_s17 }
  0x5a   : > { %p2785_p4 = scmp.ne.s32.totalorder %s379_s17, %s2784_s16  ;;  %p2793_p9 = scmp.lt.s32.totalorder %s2784_s16, %s2784_s16 }
  0x5c   : > { %p2787_p5 = pnand %p2785_p4, %p3081_p2  ;;  %p2794_p11 = por %p2793_p9, %p2792_p7 }
  0x5e   : > { %p2788_p6 = pneg %p2787_p5 }
  0x60   : > { %p2795_p13 = pnand %p2794_p11, %p2788_p6 }
  0x62   : > { %2798 = shalt.err (!%p2795_p13)
}
  0x63   : > { %2596 = dma.hbm_to_vmem [thread:$0]  (!%p3069_p0), %s3521_s6, 256, %s379_s17, [#allocation8], %s2907_s11, %s2907_s11, %s2908_s23  }
  0x64   : > { %p3563_p3 = scmp.ne.s32.totalorder %s3558_s13, 0 }
  0x65   : > { %p3564_p8 = scmp.ne.s32.totalorder (!%p3563_p3), %s3559_s26, 0 }
  0x66   : > { %420 = sbr.rel (%p3563_p3) target bundleno = 2547 (0x9f3), region = 68 }
  0x6d   : > { %2860 = dma.done.wait (%p3564_p8), [#allocation5], 256  }
  0x6e   : > { %2862 = vsyncadd (%p3564_p8), [#allocation5], 4294967040 }
  0x6f   : > { %2864 = dma.done.wait (%p3564_p8), [#allocation8], 768  }
  0x70   : > { %2866 = vsyncadd (%p3564_p8), [#allocation8], 4294966528  ;;  %s470_s13 = sand.u32 1, %s2877_s22   ;;  %p473_p0 = scmp.lt.s32.totalorder %s2889_s25, 1 }
  0x71   : > { %s3147_s18 = sshll.u32 %s470_s13, 3  ;;  %p475_p2 = scmp.lt.s32.totalorder %s2885_s24, 1 }
  0x72   : > { %s474_s15 = scalar_select %p473_p0, %s2889_s25, 1 }
  0x73   : > { %s476_s11 = scalar_select %p475_p2, %s2885_s24, 1 }
  0x74   : > { %s2400_s23 = sshll.u32 %s474_s15, 1  ;;  %s472_s30 = scalar_lea.vmem [#allocation10], %s3147_s18 }
  0x75   : > { %s478_s28 = sadd.s32 %s2400_s23, %s476_s11  ;;  %p2402_p10 = scmp.ne.s32.totalorder %s2885_s24, 0 }
  0x76   : > { %s2401_s17 = sshll.u32 %s478_s28, 3  ;;  %v486_v0 = vld [vmem:[#allocation7] sm:$0xff] (!%p2402_p10)  ;;  %vm490_vm0 = vcmask (!%p2402_p10), 130048   ;;  %v487_v1 = vld [vmem:[#allocation7 + $0x8] sm:$0xff] (!%p2402_p10)  ;;  %v488_v2 = vld [vmem:[#allocation7 + $0x10] sm:$0xff] (!%p2402_p10)  ;;  %vm496_vm1 = vcmask (!%p2402_p10), 123904  }
  0x77   : > { %s480_s27 = scalar_lea.vmem %s3515_s0, %s2401_s17  ;;  %485 = sbr.rel (%p2402_p10) target bundleno = 126 (0x7e), region = 84  ;;  %491 = vst.msk [vmem:[#allocation2] sm:$0xff] (!%p2402_p10), %vm490_vm0, %v486_v0  ;;  %492 = vst.msk [vmem:[#allocation2 + $0x8] sm:$0xff] (!%p2402_p10), %vm490_vm0, %v487_v1  ;;  %v489_v3 = vld [vmem:[#allocation7 + $0x18] sm:$0xff] (!%p2402_p10)  ;;  %v495_v4 = vld [vmem:[%s3520_s5] sm:$0x3] (!%p2402_p10) }
  0x78   : > { %493 = vst.msk [vmem:[#allocation2 + $0x10] sm:$0xff] (!%p2402_p10), %vm490_vm0, %v488_v2  ;;  %494 = vst.msk [vmem:[#allocation2 + $0x18] sm:$0xff] (!%p2402_p10), %vm490_vm0, %v489_v3 }
  0x79   : > { %497 = vst.msk [vmem:[#allocation3] sm:$0x3] (!%p2402_p10), %vm496_vm1, %v495_v4 }
  0x7e PF: > { %v2689_v5 = vld [vmem:[%s3516_s1] sm:$0xff]   ;;  %v2910_v6 = vmov 0.0   ;;  %v2690_v7 = vld [vmem:[%s3516_s1 + $0x8] sm:$0xff]   ;;  %vm2911_vm2 = vmmov 0   ;;  %vm516_vm3 = vcmask 261120   ;;  %s2912_s12 = smov 96   ;;  %v573_v27 = vlaneseq }
  0x7f   : > { %2483 = vmatprep.subr.bf16.mxu0 %v2910_v6  ;;  %2487 = vmatprep.mubr.msk.bf16.mxu0 %vm2911_vm2, %v2910_v6  ;;  %v3169_v8 = vld [vmem:[%s480_s27] sm:$0xff]  ;;  %s2913_s15 = smov 112   ;;  %v3188_v16 = vld [vmem:[#allocation2 + $0x8] sm:$0xff]  ;;  %v2914_v17 = vmov 0.0|0.0   ;;  %v2915_v23 = vmov 1966171168  }
  0x80   : > { %2484 = vmatpush3.bf16.msra.mxu0 %v2689_v5  ;;  %2495 = vmatprep.mubr.msk.f32.mxu1 %vm2911_vm2, %v2910_v6  ;;  %v499_v9 = vpack.c.bf16 %v3169_v8, %v3169_v8  ;;  %v3186_v15 = vld [vmem:[#allocation2] sm:$0xff]  ;;  %v1325_v24 = vunpack.c.l.s4 %v2915_v23  ;;  %v2916_v25 = vmov 1983009808   ;;  %v2917_v28 = vmov 1934713408   ;;  %v3238_v3 = vld [vmem:[#allocation2 + $0x10] sm:$0xff] }
  0x81   : > { %2485 = vmatprep.subr.bf16.mxu0 %v2910_v6  ;;  %2567 = vmatprep.subr.bf16.mxu1 %v2914_v17  ;;  %v2568_v18 = vpack.c.bf16 %v3188_v16, %v3186_v15  ;;  %v571_v26 = vunpack.c.l.s4 %v2916_v25  ;;  %v602_v29 = vunpack.c.l.s4 %v2917_v28  ;;  %v574_v32 = vshrl.u32 %v573_v27, 7  ;;  %v3207_v37 = vld [vmem:[#allocation3] sm:$0x3]  ;;  %v3240_v4 = vld [vmem:[#allocation2 + $0x18] sm:$0xff]  ;;  %s2918_s11 = smov 64   ;;  %s2919_s17 = smov 16  }
  0x82   : > { %v1326_v30 = vunpack.c.0.s8 %v1325_v24  ;;  %vm1176_vm5 = vcmask 130048   ;;  %vm1466_vm6 = vcmask 64512   ;;  %vm1496_vm7 = vcmask 1043456   ;;  %s2445_s23 = sshll.u32 %s2889_s25, 1  ;;  %s3565_s28 = sld [smem:[#allocation20_spill]] }
  0x83   : > { %2569 = vmatpush3.bf16.msra.mxu1 %v2568_v18  ;;  %v572_v31 = vunpack.c.0.s8 %v571_v26  ;;  %v603_v33 = vunpack.c.0.s8 %v602_v29  ;;  %v3233_v61 = vsub.s32 0, %v574_v32  ;;  %vm1836_vm8 = vcmask 1041409   ;;  %s3566_s27 = sld [smem:[#allocation24_spill]]  ;;  %s3567_s14 = sld [smem:[#allocation25_spill]] }
  0x84   : > { %2486 = vmatpush3.bf16.msra.mxu0 %v2690_v7  ;;  %2570 = vmatprep.subr.bf16.mxu1 %v2914_v17  ;;  %v3201_v34 = vsub.s32 %v1326_v30, %v574_v32  ;;  %vm1840_vm9 = vcmask 123904   ;;  %vm2187_vm10 = vcmask 523264   ;;  %s2279_s16 = sshll.u32 %s472_s30, 4  ;;  %s3568_s25 = sld [smem:[#allocation26_spill]]  ;;  %s3459_s16 = int_to_ptr.vmem [resolvable:$true] %s2279_s16 }
  0x85   : > { %2517 = vmatprep.subr.bf16.mxu0 %v2910_v6  ;;  %v3205_v36 = vsub.s32 %v572_v31, %v574_v32  ;;  %v3217_v42 = vsub.s32 %v603_v33, %v574_v32 }
  0x86   : > { %v3221_v43 = vrot.slane %v3207_v37, %v3201_v34 }
  0x87   : > { %2488 = vmatmul.mubr.msk.bf16.vlgmr.msra.gmra.mrb[0].mxu0 %vm516_vm3, %v499_v9 }
  0x88   : > { %2519 = vmatprep.mubr.msk.bf16.mxu0 %vm2911_vm2, %v2910_v6  ;;  %v1331_v52 = vcombine.high %v3221_v43, %v3221_v43  ;;  %p3570_p1 = scmp.ne.s32.totalorder %s3565_s28, 0 }
  0x8a   : > { %v1345_v1 = vrot.slane %v1331_v52, %v3201_v34 }
  0x8c   : > { %v1353_v9 = vrot.slane %v1345_v1, %v3233_v61 }
 0x15a   : > { %v3180_v10 = vpop.f32.mrb[0].mxu0 }
 0x15b   : > { %v562_v11 = vmul.f32 1.442695, %v3180_v10  ;;  %685 = vrot.lane.b32.xlu1 %v3180_v10, %s2912_s12  ;;  %566 = vrot.lane.b32.xlu0 %v3180_v10, %s2913_s15  ;;  %v2489_v12 = vpop.f32.mrb[1].mxu0  ;;  %v561_v19 = vadd.f32 1.0, %v3180_v10  ;;  %vm560_vm4 = vcmp.gt.f32.partialorder %v3180_v10, 0.0  ;;  %v569_v18 = vcombine.high %v3180_v10, %v2910_v6 }
 0x15c   : > { %v557_v13 = vpop.f32.mrb[2].mxu0  ;;  %v576_v25 = vrot.slane %v3180_v10, %v3205_v36 }
 0x15d   : > { %2699 = vpow2.f32 %v562_v11  ;;  %v2490_v14 = vpop.f32.mrb[3].mxu0  ;;  %v2571_v11 = vpack.c.bf16 %v3240_v4, %v3238_v3  ;;  %v583_v23 = vrot.slane %v569_v18, %v3205_v36 }
 0x167   : > { %v2700_v20 = vpop.eup %2699 }
 0x168   : > { %v3194_v21 = vsel %vm560_vm4, %v561_v19, %v2700_v20 }
 0x169   : > { %930 = vrot.lane.b32.xlu0 %v3194_v21, %s2913_s15  ;;  %v933_v35 = vcombine.high %v3194_v21, %v2910_v6  ;;  %v940_v39 = vrot.slane %v3194_v21, %v3205_v36  ;;  %s3569_s15 = smov %s3568_s25 }
 0x16b   : > { %v947_v44 = vrot.slane %v933_v35, %v3205_v36 }
 0x1cd   : > { %v3197_v22 = vpop.permute.xlu0 %566  ;;  %v686_v20 = vpop.permute.xlu1 %685 }
 0x1ce   : > { %687 = vrot.lane.b32.xlu1 %v3197_v22, %s2912_s12  ;;  %v584_v17 = vcombine.high %v3197_v22, %v2910_v6  ;;  %v591_v24 = vrot.slane %v3197_v22, %v3205_v36  ;;  %v691_v28 = vcombine.high %v686_v20, %v2910_v6  ;;  %v698_v32 = vrot.slane %v686_v20, %v3205_v36 }
 0x1d0   : > { %v598_v19 = vrot.slane %v584_v17, %v3205_v36  ;;  %v599_v29 = vcombine.low %v576_v25, %v591_v24  ;;  %v600_v30 = vcombine.high %v576_v25, %v591_v24 }
 0x1d2   : > { %v615_v26 = vcombine.low %v583_v23, %v598_v19  ;;  %v616_v27 = vcombine.high %v583_v23, %v598_v19 }
 0x1db   : > { %v3209_v38 = vpop.permute.xlu0 %930 }
 0x1dc   : > { %v948_v40 = vcombine.high %v3209_v38, %v2910_v6  ;;  %v955_v41 = vrot.slane %v3209_v38, %v3205_v36 }
 0x1de   : > { %v962_v45 = vrot.slane %v948_v40, %v3205_v36  ;;  %v963_v46 = vcombine.low %v940_v39, %v955_v41  ;;  %v964_v47 = vcombine.high %v940_v39, %v955_v41  ;;  %v623_v39 = vrot.slane %v615_v26, %v3217_v42 }
 0x1df   : > { %v630_v40 = vrot.slane %v616_v27, %v3217_v42  ;;  %v705_v41 = vrot.slane %v691_v28, %v3205_v36 }
 0x1e0   : > { %v971_v48 = vrot.slane %v963_v46, %v3217_v42  ;;  %v978_v49 = vrot.slane %v964_v47, %v3217_v42  ;;  %v979_v50 = vcombine.low %v947_v44, %v962_v45  ;;  %v980_v51 = vcombine.high %v947_v44, %v962_v45 }
 0x1e1   : > { %v607_v47 = vrot.slane %v599_v29, %v3217_v42 }
 0x1e2   : > { %v987_v53 = vrot.slane %v979_v50, %v3217_v42  ;;  %v994_v54 = vrot.slane %v980_v51, %v3217_v42  ;;  %v999_v55 = vcombine.low %v971_v48, %v978_v49  ;;  %v2412_v56 = vcombine.high %v971_v48, %v978_v49 }
 0x1e3   : > { %v614_v48 = vrot.slane %v600_v30, %v3217_v42 }
 0x1e4   : > { %v1006_v57 = vrot.slane %v999_v55, %v3205_v36  ;;  %v1014_v58 = vrot.slane %v2412_v56, %v3205_v36  ;;  %v1015_v59 = vcombine.low %v987_v53, %v994_v54  ;;  %v2413_v60 = vcombine.high %v987_v53, %v994_v54 }
 0x1e5   : > { %v651_v53 = vcombine.low %v623_v39, %v630_v40  ;;  %v2407_v54 = vcombine.high %v623_v39, %v630_v40 }
 0x1e6   : > { %v1022_v62 = vrot.slane %v1015_v59, %v3205_v36  ;;  %v1030_v63 = vrot.slane %v2413_v60, %v3205_v36  ;;  %v1031_v0 = vcombine.low %v1006_v57, %v1014_v58  ;;  %v635_v59 = vcombine.low %v607_v47, %v614_v48 }
 0x1e7   : > { %v2406_v60 = vcombine.high %v607_v47, %v614_v48 }
 0x1e8   : > { %v1039_v2 = vcombine.low %v1022_v62, %v1030_v63  ;;  %v1038_v5 = vrot.slane %v1031_v0, %v3217_v42 }
 0x1e9   : > { %v650_v17 = vrot.slane %v2406_v60, %v3205_v36 }
 0x1ea   : > { %v1046_v7 = vrot.slane %v1039_v2, %v3217_v42  ;;  %v658_v2 = vrot.slane %v651_v53, %v3205_v36 }
 0x1ec   : > { %v3247_v12 = vcombine.low %v1038_v5, %v1046_v7  ;;  %v1048_v13 = vcombine.high %v1038_v5, %v1046_v7  ;;  %v666_v5 = vrot.slane %v2407_v54, %v3205_v36 }
 0x1ee   : > { %2496 = vmatmul.mubr.msk.f32.vlgmr.msra.gmra.mrb[0].mxu1 %vm1176_vm5, %v3247_v12  ;;  %v3251_v14 = vmul.f32 %v1353_v9, %v1048_v13  ;;  %v675_v23 = vcombine.low %v658_v2, %v666_v5 }
 0x1ef   : > { %2572 = vmatpush3.bf16.msra.mxu1 %v2571_v11  ;;  %2502 = vmatprep.mubr.msk.f32.mxu1 %vm2911_vm2, %v2910_v6 }
 0x1f0   : > { %2505 = vmatprep.subr.bf16.mxu1 %v2910_v6  ;;  %v682_v27 = vrot.slane %v675_v23, %v3217_v42 }
 0x1f2   : > { %2503 = vmatmul.mubr.msk.f32.vlgmr.msra.gmra.mrb[2].mxu1 %vm1176_vm5, %v1048_v13  ;;  %v642_v13 = vrot.slane %v635_v59, %v3205_v36  ;;  %v1338_v59 = vrot.slane %v3221_v43, %v3201_v34 }
 0x1f3   : > { %2507 = vmatprep.mubr.msk.bf16.mxu1 %vm2911_vm2, %v2910_v6 }
 0x1f4   : > { %v667_v24 = vcombine.low %v642_v13, %v650_v17  ;;  %v1349_v60 = vrot.slane %v1338_v59, %v3233_v61 }
 0x1f6   : > { %v674_v29 = vrot.slane %v667_v24, %v3217_v42 }
 0x1f8   : > { %v684_v39 = vcombine.high %v674_v29, %v682_v27 }
 0x1fa   : > { %v1369_v40 = vpack.c.bf16 %v684_v39, %v684_v39 }
 0x240   : > { %v688_v31 = vpop.permute.xlu1 %687 }
 0x241   : > { %v706_v33 = vcombine.high %v688_v31, %v2910_v6  ;;  %v713_v35 = vrot.slane %v688_v31, %v3205_v36  ;;  %v683_v31 = vcombine.low %v674_v29, %v682_v27 }
 0x243   : > { %v720_v44 = vrot.slane %v706_v33, %v3205_v36  ;;  %v721_v45 = vcombine.low %v698_v32, %v713_v35  ;;  %v722_v46 = vcombine.high %v698_v32, %v713_v35  ;;  %v1368_v33 = vpack.c.bf16 %v683_v31, %v683_v31 }
 0x245   : > { %v729_v49 = vrot.slane %v721_v45, %v3217_v42  ;;  %v736_v50 = vrot.slane %v722_v46, %v3217_v42  ;;  %v737_v51 = vcombine.low %v705_v41, %v720_v44  ;;  %v738_v52 = vcombine.high %v705_v41, %v720_v44 }
 0x247   : > { %v745_v55 = vrot.slane %v737_v51, %v3217_v42  ;;  %v752_v56 = vrot.slane %v738_v52, %v3217_v42  ;;  %v757_v57 = vcombine.low %v729_v49, %v736_v50  ;;  %v2408_v58 = vcombine.high %v729_v49, %v736_v50 }
 0x249   : > { %v764_v62 = vrot.slane %v757_v57, %v3205_v36  ;;  %v772_v63 = vrot.slane %v2408_v58, %v3205_v36  ;;  %v773_v0 = vcombine.low %v745_v55, %v752_v56  ;;  %v2409_v1 = vcombine.high %v745_v55, %v752_v56 }
 0x24b   : > { %v780_v7 = vrot.slane %v773_v0, %v3205_v36  ;;  %v788_v9 = vrot.slane %v2409_v1, %v3205_v36  ;;  %v789_v11 = vcombine.low %v764_v62, %v772_v63  ;;  %v1356_v62 = vmul.f32 %v1349_v60, %v3247_v12 }
 0x24d   : > { %v797_v18 = vcombine.low %v780_v7, %v788_v9  ;;  %v796_v19 = vrot.slane %v789_v11, %v3217_v42  ;;  %v1358_v63 = vsel %vm1176_vm5, %v1356_v62, 0.0 }
 0x24f   : > { %v804_v20 = vrot.slane %v797_v18, %v3217_v42 }
 0x251   : > { %v805_v25 = vcombine.low %v796_v19, %v804_v20  ;;  %v806_v30 = vcombine.high %v796_v19, %v804_v20  ;;  %v1361_v19 = vsel %vm1176_vm5, %v3251_v14, 0.0 }
 0x253   : > { %v1370_v26 = vpack.c.bf16 %v805_v25, %v805_v25  ;;  %v1371_v32 = vpack.c.bf16 %v806_v30, %v806_v30 }
 0x255   : > { %v1376_v28 = vsel %vm1176_vm5, %v1370_v26, 0  ;;  %v1422_v35 = vsel %vm1176_vm5, %v1371_v32, 0 }
 0x256   : > { %2506 = vmatpush3.bf16.xpose.msra.mxu1 %v1376_v28 }
 0x257   : > { %2511 = vmatprep.subr.bf16.mxu1 %v2910_v6 }
 0x25d   : > { %2508 = vmatmul.mubr.msk.bf16.vlgmr.msra.gmra.mrb[4].mxu1 %vm1176_vm5, %v1368_v33 }
 0x25e   : > { %2512 = vmatpush3.bf16.xpose.msra.mxu1 %v1422_v35  ;;  %2513 = vmatprep.mubr.msk.bf16.mxu1 %vm2911_vm2, %v2910_v6 }
 0x25f   : > { %2523 = vmatprep.subr.bf16.mxu1 %v2910_v6 }
 0x265   : > { %2514 = vmatmul.mubr.msk.bf16.vlgmr.msra.gmra.mrb[8].mxu1 %vm1176_vm5, %v1369_v40 }
 0x266   : > { %2525 = vmatprep.mubr.msk.bf16.mxu1 %vm2911_vm2, %v2910_v6 }
 0x2c1   : > { %v1246_v41 = vpop.f32.mrb[0].mxu1 }
 0x2c2   : > { %v2497_v44 = vpop.f32.mrb[1].mxu1 }
 0x2c5   : > { %v3305_v45 = vpop.f32.mrb[2].mxu1 }
 0x2c6   : > { %v2504_v46 = vpop.f32.mrb[3].mxu1 }
 0x330   : > { %v1412_v47 = vpop.f32.mrb[4].mxu1 }
 0x331   : > { %v1464_v48 = vmul.f32 0.25, %v1412_v47  ;;  %v2509_v49 = vpop.f32.mrb[5].mxu1 }
 0x332   : > { %v1415_v50 = vpop.f32.mrb[6].mxu1 }
 0x333   : > { %v2510_v51 = vpop.f32.mrb[7].mxu1  ;;  %v1467_v52 = vsel %vm1466_vm6, %v1464_v48, -inf }
 0x334   : > { %1468 = vmax.xlane.f32.xlu0 %v1467_v52 }
 0x338   : > { %v1458_v53 = vpop.f32.mrb[8].mxu1 }
 0x339   : > { %v1465_v54 = vmul.f32 0.25, %v1458_v53  ;;  %v2515_v55 = vpop.f32.mrb[9].mxu1 }
 0x33a   : > { %v1461_v56 = vpop.f32.mrb[10].mxu1 }
 0x33b   : > { %v2516_v57 = vpop.f32.mrb[11].mxu1  ;;  %v1470_v58 = vsel %vm1466_vm6, %v1465_v54, -inf }
 0x33c   : > { %1471 = vmax.xlane.f32.xlu1 %v1470_v58 }
 0x34d   : > { %807 = vrot.lane.b32.xlu1 %v3180_v10, %s2918_s11 }
 0x371   : > { %1359 = vadd.xlane.f32.xlu1 %v1358_v63 }
 0x382   : > { %1049 = vrot.lane.b32.xlu1 %v3194_v21, %s2912_s12 }
 0x3c1   : > { %v1469_v0 = vpop.xlane.xlu0 %1468 }
 0x3c2   : > { %v1473_v1 = vsub.f32 %v1464_v48, %v1469_v0 }
 0x3c4   : > { %v1475_v2 = vmul.f32 1.442695, %v1473_v1 }
 0x3c6   : > { %2701 = vpow2.f32 %v1475_v2 }
 0x3c9   : > { %v1472_v5 = vpop.xlane.xlu1 %1471 }
 0x3ca   : > { %v1474_v7 = vsub.f32 %v1465_v54, %v1472_v5 }
 0x3cc   : > { %v1477_v10 = vmul.f32 1.442695, %v1474_v7 }
 0x3cd   : > { %v808_v13 = vpop.permute.xlu1 %807 }
 0x3ce   : > { %2703 = vpow2.f32 %v1477_v10  ;;  %v813_v24 = vcombine.high %v808_v13, %v2910_v6 }
 0x3d0   : > { %v2702_v9 = vpop.eup %2701  ;;  %v827_v28 = vrot.slane %v813_v24, %v3205_v36 }
 0x3d1   : > { %v1479_v43 = vsel %vm1466_vm6, %v2702_v9, 0.0 }
 0x3d2   : > { %1480 = vadd.xlane.f32.xlu0 %v1479_v43 }
 0x3d8   : > { %v2704_v11 = vpop.eup %2703 }
 0x3d9   : > { %v1482_v12 = vsel %vm1466_vm6, %v2704_v11, 0.0 }
 0x3da   : > { %1483 = vadd.xlane.f32.xlu0 %v1482_v12 }
 0x3f0   : > { %809 = vrot.lane.b32.xlu0 %v3197_v22, %s2918_s11  ;;  %v820_v22 = vrot.slane %v808_v13, %v3205_v36 }
 0x3fe   : > { %v1360_v21 = vpop.xlane.xlu1 %1359 }
 0x3ff   : > { %2705 = vrcp.f32 %v1360_v21 }
 0x402   : > { %v1050_v7 = vpop.permute.xlu1 %1049 }
 0x409   : > { %v2706_v17 = vpop.eup %2705 }
 0x40a   : > { %v3320_v18 = vmul.f32 %v2706_v17, %v1246_v41 }
 0x40f   : > { %1362 = vadd.xlane.f32.xlu0 %v1361_v19 }
 0x425   : > { %1051 = vrot.lane.b32.xlu0 %v3209_v38, %s2912_s12 }
 0x45f   : > { %v1481_v20 = vpop.xlane.xlu0 %1480 }
 0x460   : > { %2707 = vrcp.f32 %v1481_v20 }
 0x467   : > { %v1484_v23 = vpop.xlane.xlu0 %1483 }
 0x468   : > { %2709 = vrcp.f32 %v1484_v23 }
 0x46a   : > { %v2708_v53 = vpop.eup %2707 }
 0x46b   : > { %v810_v25 = vpop.permute.xlu0 %809  ;;  %v1487_v59 = vmul.f32 %v2708_v53, %v2702_v9  ;;  %v1055_v9 = vcombine.high %v1050_v7, %v2910_v6 }
 0x46c   : > { %v828_v26 = vcombine.high %v810_v25, %v2910_v6  ;;  %v835_v27 = vrot.slane %v810_v25, %v3205_v36 }
 0x46d   : > { %v1489_v2 = vpack.c.bf16 %v1487_v59, %v1487_v59  ;;  %v1069_v21 = vrot.slane %v1055_v9, %v3205_v36 }
 0x46e   : > { %v842_v29 = vrot.slane %v828_v26, %v3205_v36  ;;  %v843_v14 = vcombine.low %v820_v22, %v835_v27  ;;  %v844_v30 = vcombine.high %v820_v22, %v835_v27 }
 0x470   : > { %v851_v38 = vrot.slane %v843_v14, %v3217_v42  ;;  %v858_v31 = vrot.slane %v844_v30, %v3217_v42  ;;  %v859_v32 = vcombine.low %v827_v28, %v842_v29  ;;  %v860_v33 = vcombine.high %v827_v28, %v842_v29 }
 0x472   : > { %v867_v35 = vrot.slane %v859_v32, %v3217_v42  ;;  %v874_v39 = vrot.slane %v860_v33, %v3217_v42  ;;  %v879_v40 = vcombine.low %v851_v38, %v858_v31  ;;  %v2410_v41 = vcombine.high %v851_v38, %v858_v31  ;;  %v2710_v56 = vpop.eup %2709 }
 0x473   : > { %v1488_v60 = vmul.f32 %v2710_v56, %v2704_v11  ;;  %v1062_v11 = vrot.slane %v1050_v7, %v3205_v36 }
 0x474   : > { %v886_v44 = vrot.slane %v879_v40, %v3205_v36  ;;  %v894_v46 = vrot.slane %v2410_v41, %v3205_v36  ;;  %v895_v47 = vcombine.low %v867_v35, %v874_v39  ;;  %v2411_v48 = vcombine.high %v867_v35, %v874_v39 }
 0x475   : > { %v1490_v5 = vpack.c.bf16 %v1488_v60, %v1488_v60 }
 0x476   : > { %v902_v49 = vrot.slane %v895_v47, %v3205_v36  ;;  %v910_v50 = vrot.slane %v2411_v48, %v3205_v36  ;;  %v911_v51 = vcombine.low %v886_v44, %v894_v46 }
 0x478   : > { %v919_v52 = vcombine.low %v902_v49, %v910_v50  ;;  %v918_v54 = vrot.slane %v911_v51, %v3217_v42 }
 0x47a   : > { %v926_v55 = vrot.slane %v919_v52, %v3217_v42 }
 0x47c   : > { %v927_v57 = vcombine.low %v918_v54, %v926_v55  ;;  %v928_v58 = vcombine.high %v918_v54, %v926_v55 }
 0x47e   : > { %v1491_v62 = vpack.c.bf16 %v927_v57, %v927_v57  ;;  %v1492_v63 = vpack.c.bf16 %v928_v58, %v928_v58 }
 0x480   : > { %v1498_v0 = vsel %vm1496_vm7, %v1491_v62, 0  ;;  %v1544_v1 = vsel %vm1496_vm7, %v1492_v63, 0 }
 0x481   : > { %2518 = vmatpush3.bf16.msra.mxu0 %v1498_v0  ;;  %2524 = vmatpush3.bf16.msra.mxu1 %v1544_v1  ;;  %v2426_v1 = vld.sshfl [vmem:[%s3518_s3] sm:$0x11 pattern:$0x75316420] }
 0x482   : > { %2529 = vmatprep.subr.mxu0 %v927_v57  ;;  %2534 = vmatprep.subr.mxu1 %v928_v58 }
 0x484   : > { %2520 = vmatmul.mubr.msk.bf16.vlgmr.msra.gmra.mrb[4].mxu0 %vm1466_vm6, %v1489_v2  ;;  %2526 = vmatmul.mubr.msk.bf16.vlgmr.msra.gmra.mrb[12].mxu1 %vm1466_vm6, %v1490_v5  ;;  %v1851_v2 = vcombine.high %v2426_v1, %v2426_v1  ;;  %v1858_v5 = vrot.slane %v2426_v1, %v3201_v34  ;;  %v2691_v1 = vld [vmem:[#allocation4] sm:$0xff]  }
 0x485   : > { %2530 = vmatpush3.msra.mxu0 %v927_v57  ;;  %2535 = vmatpush3.msra.mxu1 %v928_v58 }
 0x486   : > { %2539 = vmatprep.subr.bf16.mxu0 %v2910_v6  ;;  %2547 = vmatprep.subr.bf16.mxu1 %v2910_v6  ;;  %v1865_v7 = vrot.slane %v1851_v2, %v3201_v34 }
 0x488   : > { %v1881_v9 = vsub.f32 1.0, %v1865_v7 }
 0x49c   : > { %v1363_v10 = vpop.xlane.xlu0 %1362 }
 0x49d   : > { %2711 = vrcp.f32 %v1363_v10  ;;  %v1880_v10 = vsub.f32 1.0, %v1858_v5 }
 0x4a0   : > { %v1052_v43 = vpop.permute.xlu0 %1051 }
 0x4a1   : > { %v1070_v12 = vcombine.high %v1052_v43, %v2910_v6  ;;  %v1077_v13 = vrot.slane %v1052_v43, %v3205_v36  ;;  %v1871_v43 = vrot.slane %v1858_v5, %v3233_v61 }
 0x4a3   : > { %v1084_v17 = vrot.slane %v1070_v12, %v3205_v36  ;;  %v1085_v19 = vcombine.low %v1062_v11, %v1077_v13  ;;  %v1086_v20 = vcombine.high %v1062_v11, %v1077_v13  ;;  %v1887_v11 = vrot.slane %v1880_v10, %v3233_v61  ;;  %v2694_v10 = vld [vmem:[#allocation9 + $0x8] sm:$0xff]  }
 0x4a4   : > { %v1875_v12 = vrot.slane %v1865_v7, %v3233_v61 }
 0x4a5   : > { %v1093_v23 = vrot.slane %v1085_v19, %v3217_v42  ;;  %v1100_v24 = vrot.slane %v1086_v20, %v3217_v42  ;;  %v1101_v25 = vcombine.low %v1069_v21, %v1084_v17  ;;  %v1102_v22 = vcombine.high %v1069_v21, %v1084_v17 }
 0x4a6   : > { %v1878_v17 = vmul.f32 %v1871_v43, %v3320_v18  ;;  %v2696_v43 = vld [vmem:[%s3523_s8 + $0x8] sm:$0xff]  }
 0x4a7   : > { %v2712_v26 = vpop.eup %2711  ;;  %v1109_v27 = vrot.slane %v1101_v25, %v3217_v42  ;;  %v1116_v28 = vrot.slane %v1102_v22, %v3217_v42  ;;  %v1121_v29 = vcombine.low %v1093_v23, %v1100_v24  ;;  %v2414_v14 = vcombine.high %v1093_v23, %v1100_v24 }
 0x4a8   : > { %v1367_v30 = vmul.f32 %v2712_v26, %v3305_v45 }
 0x4a9   : > { %v1128_v38 = vrot.slane %v1121_v29, %v3205_v36  ;;  %v1136_v31 = vrot.slane %v2414_v14, %v3205_v36  ;;  %v1137_v32 = vcombine.low %v1109_v27, %v1116_v28  ;;  %v2415_v33 = vcombine.high %v1109_v27, %v1116_v28 }
 0x4aa   : > { %v1879_v20 = vmul.f32 %v1875_v12, %v1367_v30 }
 0x4ab   : > { %v1144_v35 = vrot.slane %v1137_v32, %v3205_v36  ;;  %v1152_v39 = vrot.slane %v2415_v33, %v3205_v36  ;;  %v1153_v40 = vcombine.low %v1128_v38, %v1136_v31 }
 0x4ad   : > { %v1161_v41 = vcombine.low %v1144_v35, %v1152_v39  ;;  %v1160_v44 = vrot.slane %v1153_v40, %v3217_v42 }
 0x4af   : > { %v1168_v46 = vrot.slane %v1161_v41, %v3217_v42 }
 0x4b1   : > { %v1170_v47 = vcombine.high %v1160_v44, %v1168_v46  ;;  %v3363_v48 = vcombine.low %v1160_v44, %v1168_v46 }
 0x4b3   : > { %1699 = vxpose.xlu0.b32.start.end [1/1] (short) (narrow) %v1170_v47, 16  ;;  %v1827_v45 = vsel %vm1176_vm5, %v1170_v47, 0.0  ;;  %v1820_v49 = vsel %vm1176_vm5, %v3363_v48, 0.0 }
 0x4b4   : > { %v1828_v50 = vrot.slane %v1827_v45, 4  ;;  %v1821_v51 = vrot.slane %v1820_v49, 4 }
 0x4b6   : > { %v1829_v52 = vadd.f32 %v1828_v50, %v1827_v45  ;;  %v1822_v53 = vadd.f32 %v1821_v51, %v1820_v49 }
 0x4b8   : > { %v1830_v54 = vrot.slane %v1829_v52, 2  ;;  %v1823_v55 = vrot.slane %v1822_v53, 2 }
 0x4ba   : > { %v1831_v56 = vadd.f32 %v1830_v54, %v1829_v52  ;;  %v1824_v57 = vadd.f32 %v1823_v55, %v1822_v53 }
 0x4bc   : > { %v1832_v58 = vrot.slane %v1831_v56, 1  ;;  %v1825_v59 = vrot.slane %v1824_v57, 1 }
 0x4be   : > { %v1833_v60 = vadd.f32 %v1832_v58, %v1831_v56  ;;  %v1826_v62 = vadd.f32 %v1825_v59, %v1824_v57 }
 0x4c0   : > { %v1837_v63 = vsel %vm1836_vm8, %v1833_v60, %v1826_v62 }
 0x4c1   : > { %v1839_v0 = vadd.f32 %v1837_v63, %v3207_v37  ;;  %v1891_v37 = vrot.slane %v1881_v9, %v3233_v61  ;;  %v2693_v63 = vld [vmem:[#allocation9] sm:$0xff]   ;;  %v2695_v9 = vld [vmem:[%s3523_s8] sm:$0xff]  }
 0x4c3   : > { %1841 = vst.msk [vmem:[#allocation3] sm:$0x3] %vm1840_vm9, %v1839_v0 }
 0x533   : > { %v1715_v62 = vpop.trf.xlu0 }
 0x534   : > { %2536 = vmatprep.mubr.msk.f32.mxu1 %vm1466_vm6, %v1715_v62 }
 0x537   : > { %v1716_v0 = vpop.trf.xlu0 }
 0x538   : > { %2537 = vmatmul.mubr.msk.f32.vlgmr.msra.gmra.mrb[16].mxu1 %vm1466_vm6, %v1716_v0 }
 0x539   : > { %2548 = vmatpush3.bf16.msra.mxu1 %v2693_v63  ;;  %2551 = vmatprep.mubr.msk.bf16.mxu1 %vm2911_vm2, %v2910_v6 }
 0x53a   : > { %2549 = vmatprep.subr.bf16.mxu1 %v2910_v6 }
 0x53d   : > { %2550 = vmatpush3.bf16.msra.mxu1 %v2694_v10 }
 0x557   : > { %v1534_v13 = vpop.f32.mrb[4].mxu0  ;;  %v1580_v21 = vpop.f32.mrb[12].mxu1 }
 0x558   : > { %v1894_v19 = vmul.f32 %v1887_v11, %v1534_v13  ;;  %v1895_v23 = vmul.f32 %v1891_v37, %v1580_v21  ;;  %v2521_v24 = vpop.f32.mrb[5].mxu0  ;;  %v2527_v25 = vpop.f32.mrb[13].mxu1 }
 0x559   : > { %v1537_v34 = vpop.f32.mrb[6].mxu0  ;;  %v1583_v22 = vpop.f32.mrb[14].mxu1 }
 0x55a   : > { %v1896_v26 = vadd.f32 %v1894_v19, %v1878_v17  ;;  %v1897_v27 = vadd.f32 %v1895_v23, %v1879_v20  ;;  %v2522_v28 = vpop.f32.mrb[7].mxu0  ;;  %v2528_v29 = vpop.f32.mrb[15].mxu1  ;;  %v2697_v34 = vld [vmem:[%s3523_s8 + $0x10] sm:$0xff]  }
 0x55c   : > { %v1898_v14 = vcombine.high %v1896_v26, %v2910_v6  ;;  %v1905_v38 = vrot.slane %v1896_v26, %v3205_v36  ;;  %v1913_v61 = vcombine.high %v1897_v27, %v2910_v6  ;;  %v1920_v31 = vrot.slane %v1897_v27, %v3205_v36 }
 0x55e   : > { %v1912_v18 = vrot.slane %v1898_v14, %v3205_v36  ;;  %v1927_v30 = vrot.slane %v1913_v61, %v3205_v36  ;;  %v1928_v32 = vcombine.low %v1905_v38, %v1920_v31  ;;  %v1929_v33 = vcombine.high %v1905_v38, %v1920_v31 }
 0x560   : > { %v1936_v35 = vrot.slane %v1928_v32, %v3217_v42  ;;  %v1943_v39 = vrot.slane %v1929_v33, %v3217_v42  ;;  %v1944_v40 = vcombine.low %v1912_v18, %v1927_v30  ;;  %v1945_v41 = vcombine.high %v1912_v18, %v1927_v30 }
 0x562   : > { %v1952_v44 = vrot.slane %v1944_v40, %v3217_v42  ;;  %v1959_v46 = vrot.slane %v1945_v41, %v3217_v42  ;;  %v1964_v47 = vcombine.low %v1936_v35, %v1943_v39  ;;  %v2427_v45 = vcombine.high %v1936_v35, %v1943_v39 }
 0x564   : > { %v1971_v49 = vrot.slane %v1964_v47, %v3205_v36  ;;  %v1979_v50 = vrot.slane %v2427_v45, %v3205_v36  ;;  %v1980_v51 = vcombine.low %v1952_v44, %v1959_v46  ;;  %v2428_v52 = vcombine.high %v1952_v44, %v1959_v46 }
 0x566   : > { %v1987_v53 = vrot.slane %v1980_v51, %v3205_v36  ;;  %v1995_v54 = vrot.slane %v2428_v52, %v3205_v36  ;;  %v1996_v55 = vcombine.low %v1971_v49, %v1979_v50  ;;  %v2442_v50 = vld [vmem:[%s3566_s27] ss:$0 sm:$0xff] }
 0x567   : > { %v2443_v52 = vld [vmem:[%s3567_s14] ss:$0 sm:$0xff] }
 0x568   : > { %v2004_v56 = vcombine.low %v1987_v53, %v1995_v54  ;;  %v2003_v57 = vrot.slane %v1996_v55, %v3217_v42 }
 0x56a   : > { %v2011_v58 = vrot.slane %v2004_v56, %v3217_v42 }
 0x56c   : > { %v2013_v59 = vcombine.high %v2003_v57, %v2011_v58  ;;  %v2012_v60 = vcombine.low %v2003_v57, %v2011_v58 }
 0x56e   : > { %2015 = vrot.lane.b32.xlu1 %v2013_v59, %s2919_s17  ;;  %s2275_s17 = sadd.s32 %s2885_s24, %s2445_s23  ;;  %s2264_s24 = scalar_lea.sflag [#allocation6], %s470_s13 }
 0x56f   : > { %s2446_s19 = sshll.u32 %s2275_s17, 7  ;;  %s2799_s23 = scalar_lea.vmem %s3459_s16, 128 }
 0x570   : > { %s3457_s11 = scalar_lea.hbm %s3568_s25, %s2446_s19  ;;  %p2800_p12 = scmp.ne.s32.totalorder %s3459_s16, %s2799_s23 }
 0x571   : > { %s2920_s17 = smov [#allocation10]  }
 0x572   : > { %p2801_p4 = pnand %p2800_p12, %p3570_p1  ;;  %s2803_s26 = sshll.u32 %s2920_s17, 4  ;;  %s2804_s26 = int_to_ptr.vmem [resolvable:$false] %s2803_s26 }
 0x573   : > { %s2805_s21 = scalar_lea.vmem %s2804_s26, 256  ;;  %p2806_p6 = scmp.lt.s32.totalorder %s3459_s16, %s2804_s26 }
 0x574   : > { %p2802_p5 = pneg %p2801_p4  ;;  %p2807_p7 = scmp.lt.s32.totalorder %s2805_s21, %s2799_s23 }
 0x576   : > { %p2808_p9 = por %p2807_p7, %p2806_p6 }
 0x578   : > { %p2809_p11 = pnand %p2808_p9, %p2802_p5 }
 0x597   : > { %1586 = vxpose.xlu1.b32.start.end [1/1] (short) (narrow) %v3363_v48, 16  ;;  %v2692_v48 = vld [vmem:[#allocation4 + $0x8] sm:$0xff]  }
 0x5e0   : > { %v2016_v36 = vpop.permute.xlu1 %2015 }
 0x5e1   : > { %v2018_v5 = vsel %vm1176_vm5, %v2012_v60, %v2016_v36 }
 0x5e2   : > { %v2019_v7 = vpack.c.bf16 %v2018_v5, %v2018_v5 }
 0x60b   : > { %v2538_v11 = vpop.f32.mrb[16].mxu1 }
 0x60c   : > { %v1815_v12 = vadd.f32 %v2538_v11, %v3240_v4  ;;  %v1803_v37 = vpop.f32.mrb[17].mxu1 }
 0x60d   : > { %v1814_v13 = vadd.f32 %v1803_v37, %v3238_v3 }
 0x60e   : > { %1819 = vst.msk [vmem:[#allocation2 + $0x18] sm:$0xff] %vm1176_vm5, %v1815_v12 }
 0x60f   : > { %1818 = vst.msk [vmem:[#allocation2 + $0x10] sm:$0xff] %vm1176_vm5, %v1814_v13 }
 0x617   : > { %v1602_v42 = vpop.trf.xlu1 }
 0x618   : > { %2531 = vmatprep.mubr.msk.f32.mxu0 %vm1466_vm6, %v1602_v42 }
 0x61b   : > { %v1603_v2 = vpop.trf.xlu1 }
 0x61c   : > { %2532 = vmatmul.mubr.msk.f32.vlgmr.msra.gmra.mrb[8].mxu0 %vm1466_vm6, %v1603_v2 }
 0x61d   : > { %2540 = vmatpush3.bf16.msra.mxu0 %v2691_v1  ;;  %2543 = vmatprep.mubr.msk.bf16.mxu0 %vm2911_vm2, %v2910_v6 }
 0x61e   : > { %2541 = vmatprep.subr.bf16.mxu0 %v2910_v6 }
 0x621   : > { %2542 = vmatpush3.bf16.msra.mxu0 %v2692_v48 }
 0x622   : > { %2555 = vmatprep.subr.bf16.mxu0 %v2910_v6 }
 0x624   : > { %2544 = vmatmul.mubr.msk.bf16.vlgmr.msra.gmra.mrb[12].mxu0 %vm516_vm3, %v2019_v7 }
 0x625   : > { %2563 = vmatprep.mubr.msk.bf16.mxu0 %vm2911_vm2, %v2910_v6  ;;  %2556 = vmatpush3.bf16.msra.mxu0 %v2695_v9 }
 0x626   : > { %2557 = vmatprep.subr.bf16.mxu0 %v2910_v6 }
 0x629   : > { %2558 = vmatpush3.bf16.msra.mxu0 %v2696_v43 }
 0x62a   : > { %2559 = vmatprep.subr.bf16.mxu0 %v2910_v6 }
 0x62d   : > { %2560 = vmatpush3.bf16.msra.mxu0 %v2697_v34 }
 0x62e   : > { %2561 = vmatprep.subr.bf16.mxu0 %v2910_v6  ;;  %v2436_v6 = vld [vmem:[%s3524_s9] ss:$0 sm:$0xff] }
 0x6ef   : > { %v2533_v21 = vpop.f32.mrb[8].mxu0 }
 0x6f0   : > { %v1813_v17 = vadd.f32 %v2533_v21, %v3188_v16  ;;  %v1690_v19 = vpop.f32.mrb[9].mxu0  ;;  %v2432_v16 = vld [vmem:[%s3522_s7] ss:$0 sm:$0xff] }
 0x6f1   : > { %v1812_v20 = vadd.f32 %v1690_v19, %v3186_v15  ;;  %v2698_v15 = vld [vmem:[%s3523_s8 + $0x18] sm:$0xff]  }
 0x6f2   : > { %1817 = vst.msk [vmem:[#allocation2 + $0x8] sm:$0xff] %vm1176_vm5, %v1813_v17  ;;  %2562 = vmatpush3.bf16.msra.mxu0 %v2698_v15 }
 0x6f3   : > { %1816 = vst.msk [vmem:[#allocation2] sm:$0xff] %vm1176_vm5, %v1812_v20 }
 0x6f7   : > { %v2073_v4 = vpop.f32.mrb[12].mxu0 }
 0x6f8   : > { %v2079_v23 = vpack.c.bf16 %v2073_v4, %v2073_v4  ;;  %v2545_v3 = vpop.f32.mrb[13].mxu0 }
 0x6f9   : > { %v2076_v24 = vpop.f32.mrb[14].mxu0 }
 0x6fa   : > { %v2546_v25 = vpop.f32.mrb[15].mxu0  ;;  %2552 = vmatmul.mubr.msk.bf16.vlgmr.msra.gmra.mrb[20].mxu1 %vm516_vm3, %v2079_v23 }
 0x7cd   : > { %v2140_v22 = vpop.f32.mrb[20].mxu1 }
 0x7ce   : > { %v2141_v26 = vadd.f32 %v2432_v16, %v2140_v22  ;;  %v2553_v27 = vpop.f32.mrb[21].mxu1 }
 0x7cf   : > { %v2143_v28 = vpop.f32.mrb[22].mxu1 }
 0x7d0   : > { %v2146_v29 = vmax.f32 %v2141_v26, 0.0  ;;  %v2554_v14 = vpop.f32.mrb[23].mxu1 }
 0x7d2   : > { %v2147_v38 = vpack.c.bf16 %v2146_v29, %v2146_v29 }
 0x7d4   : > { %2564 = vmatmul.mubr.msk.bf16.vlgmr.msra.gmra.mrb[16].mxu0 %vm2187_vm10, %v2147_v38 }
 0x8a7   : > { %v2225_v61 = vpop.f32.mrb[16].mxu0 }
 0x8a8   : > { %v2226_v31 = vadd.f32 %v2436_v6, %v2225_v61  ;;  %v2565_v18 = vpop.f32.mrb[17].mxu0 }
 0x8a9   : > { %v2228_v30 = vpop.f32.mrb[18].mxu0 }
 0x8aa   : > { %v2566_v32 = vpop.f32.mrb[19].mxu0  ;;  %v2231_v33 = vadd.f32 %v2226_v31, %v3169_v8 }
 0x8ac   : > { %v2234_v35 = vsel %vm516_vm3, %v2231_v33, 0.0 }
 0x8ad   : > { %2235 = vadd.xlane.f32.xlu0 %v2234_v35 }
 0x93a   : > { %v2236_v39 = vpop.xlane.xlu0 %2235 }
 0x93b   : > { %v2238_v40 = vmul.f32 0.03125, %v2236_v39 }
 0x93d   : > { %v2239_v41 = vsub.f32 %v2231_v33, %v2238_v40 }
 0x93f   : > { %v2240_v44 = vmul.f32 %v2239_v41, %v2239_v41 }
 0x941   : > { %v2241_v46 = vsel %vm516_vm3, %v2240_v44, 0.0 }
 0x942   : > { %2242 = vadd.xlane.f32.xlu1 %v2241_v46 }
 0x9cf   : > { %v2243_v47 = vpop.xlane.xlu1 %2242 }
 0x9d0   : > { %v2244_v45 = vmul.f32 0.03125, %v2243_v47 }
 0x9d2   : > { %v2245_v49 = vadd.f32 1e-05, %v2244_v45 }
 0x9d4   : > { %2713 = vrsqrt.f32 %v2245_v49 }
 0x9de   : > { %v2714_v8 = vpop.eup %2713 }
 0x9df   : > { %v2247_v51 = vmul.f32 %v2714_v8, %v2239_v41 }
 0x9e1   : > { %v2254_v53 = vmul.f32 %v2442_v50, %v2247_v51 }
 0x9e3   : > { %v2261_v54 = vadd.f32 %v2443_v52, %v2254_v53 }
 0x9e5   : > { %2262 = vst.msk [vmem:[%s472_s30] sm:$0xff] %vm516_vm3, %v2261_v54 }
 0x9e6   : > { %2812 = shalt.err (!%p2809_p11)
}
 0x9e7   : > { %s2813_s13 = scalar_lea.hbm %s3457_s11, 128  ;;  %s2817_s27 = scalar_lea.hbm %s3569_s15, 512 }
 0x9e8   : > { %p2814_p13 = scmp.ne.s32.totalorder %s3457_s11, %s2813_s13  ;;  %p2818_p0 = scmp.lt.u32.totalorder %s3457_s11, %s3569_s15 }
 0x9e9   : > { %p2819_p2 = scmp.lt.u32.totalorder %s2817_s27, %s2813_s13  ;;  %p2821_p12 = scmp.lt.u32.totalorder %s2813_s13, %s3457_s11 }
 0x9ea   : > { %p2815_p3 = pnand %p2814_p13, %p3570_p1 }
 0x9eb   : > { %p2820_p10 = por %p2819_p2, %p2818_p0 }
 0x9ec   : > { %p2816_p8 = pneg %p2815_p3 }
 0x9ed   : > { %p2822_p4 = por %p2821_p12, %p2820_p10 }
 0x9ef   : > { %p2823_p5 = pnand %p2822_p4, %p2816_p8 }
 0x9f1   : > { %2826 = shalt.err (!%p2823_p5)
}
 0x9f2   : > { %2585 = dma.vmem_to_hbm [thread:$0]  (%p3570_p1), %s3459_s16, 128, %s3457_s11, %s2264_s24  }
 0x9f3 PF: > { %s3571_s14 = sld [smem:[#allocation18_spill]]  ;;  %s3572_s19 = sld [smem:[#allocation14_spill]] }
 0x9f4   : > { %s3573_s10 = sld [smem:[#allocation22_spill]] }
 0x9f9   : > { %p2607_p6 = scmp.ge.s32.totalorder %s3571_s14, 2  ;;  %s2291_s12 = sand.u32 1, %s3572_s19  }
 0x9fa   : > { %p3574_p7 = scmp.ne.s32.totalorder %s3573_s10, 0  ;;  %s2292_s25 = scalar_lea.sflag [#allocation6], %s2291_s12 }
 0x9fc   : > { %p2598_p9 = pnand %p2607_p6, %p3574_p7 }
 0x9fe   : > { %2868 = dma.done.wait (!%p2598_p9), %s2292_s25, 128  }
 0x9ff   : > { %2870 = vsyncadd (!%p2598_p9), %s2292_s25, 4294967168  ;;  %s27_s28 = sadd.s32 1, %s3571_s14   ;;  %s3575_s23 = sld [smem:[#allocation15_spill]] }
 0xa00   : > { %p24_p11 = scmp.ge.s32.totalorder %s27_s28, 6   ;;  %s3576_s17 = sld [smem:[#allocation23_spill]] }
 0xa01   : > { %s3577_s24 = sld [smem:[#allocation16_spill]]  ;;  %s3578_s25 = sld [smem:[#allocation17_spill]] }
 0xa02   : > { %s3579_s26 = sld [smem:[#allocation19_spill]]  ;;  %s3580_s27 = sld [smem:[#allocation21_spill]] }
 0xa03   : > { %s3581_s21 = smov %s2877_s22  ;;  %26 = sbr.rel (!%p24_p11) target bundleno = 11 (0xb), region = 120 }
 0xa05   : > { %s3582_s22 = smov %s3575_s23 }
 0xa06   : > { %s3583_s23 = smov %s3576_s17 }
 0xa0a   :  { %2297 = vsyncpa [#allocation5], 1 }
 0xa0b   :  { %2299 = vsyncpa [#allocation5 + $0x1], 1 }
 0xa0c   :  { %2300 = vsyncpa [#allocation8], 1 }
 0xa0d   :  { %2301 = vsyncpa [#allocation6], 1 }
 0xa0e   :  { %2303 = vsyncpa [#allocation6 + $0x1], 1 }

</bundles_post_ra>
